<compile_context>
chip_gen: v5e
topology: v5e:2x2
jax: 0.10.0
libtpu: 0.0.40
codegen_flags: <defaults>
</compile_context>

<pallas_src>
import numpy as np
import jax
import jax.numpy as jnp
from jax.experimental import pallas as pl
from jax.experimental.pallas import tpu as pltpu


# ------------------------------- fused kernel ------------------------------- #

def _updecoder_kernel(x0_ref, x1_ref, x2_ref, x3_ref,      # inputs (1, C_s, L_s) f32
                      m1_ref, m2_ref, m3_ref,              # interp^T (L_s, Lout) bf16
                      aw_ref,                              # fused proj+fuse (E, ΣC_s)
                      fb_ref,                              # fused fuse bias (E, 1) f32
                      ew_ref,                              # expand^T (4E, E) bf16
                      pw_ref,                              # block-diag pred (4NC, 4E)
                      pb_ref,                              # pred bias (4NC, 1) f32
                      o_ref):                              # out (1, 4NC, Lout) f32
    f32 = jnp.float32
    cdt = aw_ref.dtype                 # bf16 MXU operand dtype (f32 accumulation)
    E = fb_ref.shape[0]

    # ---- bilinear upsample of scales 1..3 to the scale-0 grid (channels-first,
    #      one matmul each); scale 0 is already at the target resolution.
    parts = [x0_ref[0]]                                                   # (C0, Lout)
    for x_ref, m_ref in ((x1_ref, m1_ref), (x2_ref, m2_ref), (x3_ref, m3_ref)):
        parts.append(jnp.dot(x_ref[0].astype(cdt), m_ref[...],
                             preferred_element_type=f32))                 # (C_s, Lout)
    # sublane-axis concat; offsets (0, C0, C0+C1, ...) are all multiples of 8 (f32 tile)
    cat = jnp.concatenate(parts, axis=0)                                  # (ΣC_s, Lout)

    # ---- per-scale projections + linear_fuse + eval-BN + all biases, folded into one
    #      matmul in the wrapper; + ReLU.
    y = jnp.dot(aw_ref[...], cat.astype(cdt),
                preferred_element_type=f32) + fb_ref[...]                 # (E, Lout)
    y = jnp.maximum(y, 0.0).astype(cdt)

    # ---- PatchExpandLi.expand (E -> 4E), single matmul.
    z = jnp.dot(ew_ref[...], y, preferred_element_type=f32)               # (4E, Lout)

    # ---- per-quadrant LayerNorm (affine folded into pred).  Quadrant q = p1*2 + p2
    #      owns channel rows [qE, (q+1)E); its columns are output pixels
    #      (2h+p1, 2w+p2) -> the einops rearrange costs no data movement.
    #      zn is cast to bf16 per quadrant so only one (E, Lout) f32 temp is live.
    zn_parts = []
    for q in range(4):
        zq = z[q * E:(q + 1) * E, :]
        mean = jnp.mean(zq, axis=0, keepdims=True)
        zc = zq - mean
        var = jnp.mean(zc * zc, axis=0, keepdims=True)
        zn_parts.append((zc * jax.lax.rsqrt(var + 1e-5)).astype(cdt))
    zn = jnp.concatenate(zn_parts, axis=0)                                # (4E, Lout)

    # ---- block-diagonal linear_pred: all 4 quadrants in ONE matmul, ONE wide store.
    o_ref[0] = jnp.dot(pw_ref[...], zn, preferred_element_type=f32) + pb_ref[...]


# ----------------------------------- glue ------------------------------------ #

def _interp_matrix(out_size, in_size):
    """Row-stochastic 1-D bilinear interp matrix, PyTorch align_corners=False."""
    A = np.zeros((out_size, in_size), dtype=np.float32)
    scale = in_size / out_size
    for j in range(out_size):
        src = (j + 0.5) * scale - 0.5
        src = max(src, 0.0)
        i0 = min(int(np.floor(src)), in_size - 1)
        i1 = min(i0 + 1, in_size - 1)
        lam = src - i0
        A[j, i0] += 1.0 - lam
        A[j, i1] += lam
    return A


def _multi_tensorcore_chip():
    """True on chips with >1 TensorCore sharing HBM (v4 / v5p / v7x)."""
    try:
        kind = jax.devices()[0].device_kind.lower()
    except Exception:
        return False
    return any(tag in kind for tag in ("v4", "v5p", "v7", "7x"))


def up_decoder_forward(intermediates, resolutions, params):
    E = params["embedding_dim"]
    NC = params["num_classes"]
    H0, W0 = resolutions[0]
    L0 = H0 * W0
    B = intermediates[0].shape[0]
    cdt = jnp.bfloat16   # MXU operand dtype (f32 accumulation inside the kernel)

    # ---- weight folding (done once at model-load time in a real deployment) -------
    # eval-mode BatchNorm + the four projection biases folded into linear_fuse.
    bn_scale = params["bn_gamma"] / jnp.sqrt(params["bn_var"] + 1e-5)
    bn_shift = params["bn_beta"] - params["bn_mean"] * bn_scale
    fuse_w_f = params["fuse_w"] * bn_scale[None, :]                    # (4E, E)
    bias_cat = jnp.concatenate(params["lin_b"])                        # (4E,)
    fuse_b_f = bn_shift + bias_cat @ fuse_w_f                          # (E,)
    fuse_wT = fuse_w_f.T                                               # (E, 4E)

    # fold linear_fuse into the per-scale projections: A_s = fuse_wT_s @ W_s^T.
    A_all = jnp.concatenate(
        [fuse_wT[:, s * E:(s + 1) * E] @ params["lin_w"][s].T for s in range(4)],
        axis=1).astype(cdt)                                            # (E, ΣC_s)
    fuse_b = fuse_b_f[:, None].astype(jnp.float32)                     # (E, 1)

    expand_wT = params["expand_w"].T.astype(cdt)                       # (4E, E)

    # fold the LayerNorm affine into linear_pred; block-diagonal over the 4 quadrants.
    pred_wT = (params["ln_gamma"][:, None] * params["pred_w"]).T       # (NC, E)
    pred_b_f = params["ln_beta"] @ params["pred_w"] + params["pred_b"]  # (NC,)
    pred_bd_w = jnp.kron(jnp.eye(4, dtype=jnp.float32), pred_wT).astype(cdt)  # (4NC,4E)
    pred_bd_b = jnp.tile(pred_b_f, 4)[:, None].astype(jnp.float32)     # (4NC, 1)

    # transposed bilinear-interp matrices for scales 1..3 (scale 0 is the identity).
    # TODO(synk): at real SegFormer resolutions use two separable 1-D interp matmuls
    # and tile L0 on a grid axis sized from pltpu.get_tpu_info().vmem_capacity_bytes.
    ms = []
    for i in range(1, len(intermediates)):
        Hi, Wi = resolutions[i]
        ms.append(np.kron(_interp_matrix(H0, Hi), _interp_matrix(W0, Wi)).T)  # (L_i,L0)

    if _multi_tensorcore_chip():
        # v7x / v5p / v4: grid=(B,) "parallel" -> each TensorCore takes one element.
        # TODO(synk): verify in the trace that the 2-TC split happens at B=2; if not,
        # switch this axis to pltpu.CORE_PARALLEL.
        Bg, Lout = B, L0
        xs = [jnp.swapaxes(x, 1, 2).astype(jnp.float32) for x in intermediates]
        ms_k = [jnp.asarray(m, cdt) for m in ms]
    else:
        # v5e / v6e: single TC -> collapse the batch grid by folding batch into the
        # lane axis (columns are b*L + l), one pallas_call step, N = B*L0.
        Bg, Lout = 1, B * L0
        xs = [jnp.transpose(x, (2, 0, 1))
              .reshape(1, x.shape[2], B * x.shape[1]).astype(jnp.float32)
              for x in intermediates]
        eyeB = np.eye(B, dtype=np.float32)
        ms_k = [jnp.asarray(np.kron(eyeB, m), cdt) for m in ms]

    def x_spec(x):
        return pl.BlockSpec((1,) + x.shape[1:], lambda i: (i, 0, 0))

    def w_spec(w):
        return pl.BlockSpec(w.shape, lambda i: (0, 0))

    consts = (A_all, fuse_b, expand_wT, pred_bd_w, pred_bd_b)
    out_k = pl.pallas_call(
        _updecoder_kernel,
        out_shape=jax.ShapeDtypeStruct((Bg, 4 * NC, Lout), jnp.float32),
        grid=(Bg,),
        in_specs=([x_spec(x) for x in xs]
                  + [w_spec(m) for m in ms_k]
                  + [w_spec(c) for c in consts]),
        out_specs=pl.BlockSpec((1, 4 * NC, Lout), lambda i: (i, 0, 0)),
        compiler_params=pltpu.CompilerParams(dimension_semantics=("parallel",)),
    )(*xs, *ms_k, *consts)

    if Bg == 1:
        out_k = out_k.reshape(4 * NC, B, L0).transpose(1, 0, 2)        # (B, 4NC, L0)
    # out_k rows are ordered (p1, p2, class), columns are h*W0 + w.  A downstream
    # consumer that accepts this layout could skip the reshape/transpose below.
    out = out_k.reshape(B, 2, 2, NC, H0, W0).transpose(0, 3, 4, 1, 5, 2)
    return out.reshape(B, NC, 2 * H0, 2 * W0)                          # NCHW


def reference_forward(intermediates, resolutions, params):
    """Pure-JAX f32 reference with the original (unfolded) math."""
    E = params["embedding_dim"]
    H0, W0 = resolutions[0]
    L0 = H0 * W0
    B = intermediates[0].shape[0]
    ups = []
    for i, x in enumerate(intermediates):
        Hi, Wi = resolutions[i]
        M = jnp.asarray(np.kron(_interp_matrix(H0, Hi), _interp_matrix(W0, Wi)))
        proj = x @ params["lin_w"][i] + params["lin_b"][i]
        ups.append(jnp.einsum("ol,blc->boc", M, proj))
    cat = jnp.concatenate(ups, axis=-1)
    bn_scale = params["bn_gamma"] / jnp.sqrt(params["bn_var"] + 1e-5)
    bn_shift = params["bn_beta"] - params["bn_mean"] * bn_scale
    y = jnp.maximum((cat @ params["fuse_w"]) * bn_scale + bn_shift, 0.0)
    z = y @ params["expand_w"]
    z = z.reshape(B, H0, W0, 2, 2, E).transpose(0, 1, 3, 2, 4, 5).reshape(B, 4 * L0, E)
    mean = jnp.mean(z, axis=-1, keepdims=True)
    var = jnp.mean((z - mean) ** 2, axis=-1, keepdims=True)
    zn = (z - mean) * jax.lax.rsqrt(var + 1e-5) * params["ln_gamma"] + params["ln_beta"]
    out = zn @ params["pred_w"] + params["pred_b"]
    nc = params["num_classes"]
    return out.reshape(B, 2 * H0, 2 * W0, nc).transpose(0, 3, 1, 2)


# ----------------------------------- main ------------------------------------ #

if __name__ == "__main__":
    B = 2
    intermediate_dims = [8, 16, 32, 64]
    E = 32
    NUM_CLASSES = 8
    resolutions = [(16, 16), (8, 8), (4, 4), (2, 2)]

    key = jax.random.PRNGKey(0)
    keys = jax.random.split(key, 32)
    kit = iter(keys)

    # deterministic synthetic parameters (shapes follow the module __init__)
    params = {
        "embedding_dim": E,
        "num_classes": NUM_CLASSES,
        "lin_w": [0.1 * jax.random.normal(next(kit), (c, E), jnp.float32)
                  for c in intermediate_dims],
        "lin_b": [0.05 * jax.random.normal(next(kit), (E,), jnp.float32)
                  for _ in intermediate_dims],
        "fuse_w": 0.1 * jax.random.normal(next(kit), (4 * E, E), jnp.float32),
        "bn_gamma": 1.0 + 0.05 * jax.random.normal(next(kit), (E,), jnp.float32),
        "bn_beta": 0.05 * jax.random.normal(next(kit), (E,), jnp.float32),
        "bn_mean": 0.05 * jax.random.normal(next(kit), (E,), jnp.float32),
        "bn_var": 1.0 + 0.1 * jax.nn.softplus(jax.random.normal(next(kit), (E,), jnp.float32)),
        "expand_w": 0.1 * jax.random.normal(next(kit), (E, 4 * E), jnp.float32),
        "ln_gamma": 1.0 + 0.05 * jax.random.normal(next(kit), (E,), jnp.float32),
        "ln_beta": 0.05 * jax.random.normal(next(kit), (E,), jnp.float32),
        "pred_w": 0.1 * jax.random.normal(next(kit), (E, NUM_CLASSES), jnp.float32),
        "pred_b": 0.05 * jax.random.normal(next(kit), (NUM_CLASSES,), jnp.float32),
    }

    # inputs: intermediates[i] has shape (B, H_i*W_i, C_i)
    intermediates = [
        jax.random.normal(next(kit), (B, h * w, c), jnp.float32)
        for (h, w), c in zip(resolutions, intermediate_dims)
    ]

    out = up_decoder_forward(intermediates, resolutions, params)
    out = jax.block_until_ready(out)

    ref = jax.block_until_ready(reference_forward(intermediates, resolutions, params))

    assert out.shape == (B, NUM_CLASSES, 2 * resolutions[0][0], 2 * resolutions[0][1]), out.shape
    assert bool(jnp.all(jnp.isfinite(out)))
    # kernel uses bf16 MXU operands (f32 accumulate) -> compare against the f32
    # reference at bf16-appropriate tolerance.
    assert bool(jnp.allclose(out, ref, atol=1e-1, rtol=1e-1)), "kernel/reference mismatch"

    print("KERNEL_OK")
</pallas_src>

<mosaic_0001>
module attributes {stable_mosaic.version = 11 : i64} {
  func.func @_updecoder_kernel(%arg0: i32, %arg1: memref<1x8x512xf32, #tpu.memory_space<vmem>>, %arg2: memref<1x16x128xf32, #tpu.memory_space<vmem>>, %arg3: memref<1x32x32xf32, #tpu.memory_space<vmem>>, %arg4: memref<1x64x8xf32, #tpu.memory_space<vmem>>, %arg5: memref<128x512xbf16, #tpu.memory_space<vmem>>, %arg6: memref<32x512xbf16, #tpu.memory_space<vmem>>, %arg7: memref<8x512xbf16, #tpu.memory_space<vmem>>, %arg8: memref<32x120xbf16, #tpu.memory_space<vmem>>, %arg9: memref<32x1xf32, #tpu.memory_space<vmem>>, %arg10: memref<128x32xbf16, #tpu.memory_space<vmem>>, %arg11: memref<32x128xbf16, #tpu.memory_space<vmem>>, %arg12: memref<32x1xf32, #tpu.memory_space<vmem>>, %arg13: memref<1x32x512xf32, #tpu.memory_space<vmem>>) attributes {dimension_semantics = [#tpu.dimension_semantics<parallel>], iteration_bounds = array<i64: 1>, scalar_prefetch = 0 : i64, scratch_operands = 0 : i64, tpu.core_type = #tpu.core_type<tc>, window_params = [{transform_indices = @transform_0, window_bounds = array<i64: 1, 8, 512>}, {transform_indices = @transform_1, window_bounds = array<i64: 1, 16, 128>}, {transform_indices = @transform_2, window_bounds = array<i64: 1, 32, 32>}, {transform_indices = @transform_3, window_bounds = array<i64: 1, 64, 8>}, {pipeline_mode = #tpu.pipeline_mode<synchronous>, transform_indices = @transform_4, window_bounds = array<i64: 128, 512>}, {pipeline_mode = #tpu.pipeline_mode<synchronous>, transform_indices = @transform_5, window_bounds = array<i64: 32, 512>}, {pipeline_mode = #tpu.pipeline_mode<synchronous>, transform_indices = @transform_6, window_bounds = array<i64: 8, 512>}, {pipeline_mode = #tpu.pipeline_mode<synchronous>, transform_indices = @transform_7, window_bounds = array<i64: 32, 120>}, {pipeline_mode = #tpu.pipeline_mode<synchronous>, transform_indices = @transform_8, window_bounds = array<i64: 32, 1>}, {pipeline_mode = #tpu.pipeline_mode<synchronous>, transform_indices = @transform_9, window_bounds = array<i64: 128, 32>}, {pipeline_mode = #tpu.pipeline_mode<synchronous>, transform_indices = @transform_10, window_bounds = array<i64: 32, 128>}, {pipeline_mode = #tpu.pipeline_mode<synchronous>, transform_indices = @transform_11, window_bounds = array<i64: 32, 1>}, {transform_indices = @transform_12, window_bounds = array<i64: 1, 32, 512>}]} {
    %c0 = arith.constant 0 : index
    %c0_0 = arith.constant 0 : index
    %c0_1 = arith.constant 0 : index
    %0 = vector.load %arg1[%c0, %c0_0, %c0_1] : memref<1x8x512xf32, #tpu.memory_space<vmem>>, vector<1x8x512xf32>
    %1 = vector.shape_cast %0 : vector<1x8x512xf32> to vector<8x512xf32>
    %c0_2 = arith.constant 0 : index
    %c0_3 = arith.constant 0 : index
    %c0_4 = arith.constant 0 : index
    %2 = vector.load %arg2[%c0_2, %c0_3, %c0_4] : memref<1x16x128xf32, #tpu.memory_space<vmem>>, vector<1x16x128xf32>
    %3 = vector.shape_cast %2 : vector<1x16x128xf32> to vector<16x128xf32>
    %4 = arith.truncf %3 : vector<16x128xf32> to vector<16x128xbf16>
    %c0_5 = arith.constant 0 : index
    %c0_6 = arith.constant 0 : index
    %5 = vector.load %arg5[%c0_5, %c0_6] : memref<128x512xbf16, #tpu.memory_space<vmem>>, vector<128x512xbf16>
    %cst = arith.constant dense<0.000000e+00> : vector<16x512xf32>
    %6 = tpu.matmul %4, %5, %cst {dimension_numbers = #tpu.dot_dimension_numbers<[1], [0], [0], [1], [0, 0, 1, 1], [], []>} : vector<16x128xbf16>, vector<128x512xbf16>, vector<16x512xf32> -> vector<16x512xf32>
    %c0_7 = arith.constant 0 : index
    %c0_8 = arith.constant 0 : index
    %c0_9 = arith.constant 0 : index
    %7 = vector.load %arg3[%c0_7, %c0_8, %c0_9] : memref<1x32x32xf32, #tpu.memory_space<vmem>>, vector<1x32x32xf32>
    %8 = vector.shape_cast %7 : vector<1x32x32xf32> to vector<32x32xf32>
    %9 = arith.truncf %8 : vector<32x32xf32> to vector<32x32xbf16>
    %c0_10 = arith.constant 0 : index
    %c0_11 = arith.constant 0 : index
    %10 = vector.load %arg6[%c0_10, %c0_11] : memref<32x512xbf16, #tpu.memory_space<vmem>>, vector<32x512xbf16>
    %cst_12 = arith.constant dense<0.000000e+00> : vector<32x512xf32>
    %11 = tpu.matmul %9, %10, %cst_12 {dimension_numbers = #tpu.dot_dimension_numbers<[1], [0], [0], [1], [0, 0, 1, 1], [], []>} : vector<32x32xbf16>, vector<32x512xbf16>, vector<32x512xf32> -> vector<32x512xf32>
    %c0_13 = arith.constant 0 : index
    %c0_14 = arith.constant 0 : index
    %c0_15 = arith.constant 0 : index
    %12 = vector.load %arg4[%c0_13, %c0_14, %c0_15] : memref<1x64x8xf32, #tpu.memory_space<vmem>>, vector<1x64x8xf32>
    %13 = vector.shape_cast %12 : vector<1x64x8xf32> to vector<64x8xf32>
    %14 = arith.truncf %13 : vector<64x8xf32> to vector<64x8xbf16>
    %c0_16 = arith.constant 0 : index
    %c0_17 = arith.constant 0 : index
    %15 = vector.load %arg7[%c0_16, %c0_17] : memref<8x512xbf16, #tpu.memory_space<vmem>>, vector<8x512xbf16>
    %cst_18 = arith.constant dense<0.000000e+00> : vector<64x512xf32>
    %16 = tpu.matmul %14, %15, %cst_18 {dimension_numbers = #tpu.dot_dimension_numbers<[1], [0], [0], [1], [0, 0, 1, 1], [], []>} : vector<64x8xbf16>, vector<8x512xbf16>, vector<64x512xf32> -> vector<64x512xf32>
    %17 = tpu.concatenate %1, %6, %11, %16 in 0 : vector<8x512xf32>, vector<16x512xf32>, vector<32x512xf32>, vector<64x512xf32> -> vector<120x512xf32>
    %c0_19 = arith.constant 0 : index
    %c0_20 = arith.constant 0 : index
    %18 = vector.load %arg8[%c0_19, %c0_20] : memref<32x120xbf16, #tpu.memory_space<vmem>>, vector<32x120xbf16>
    %19 = arith.truncf %17 : vector<120x512xf32> to vector<120x512xbf16>
    %cst_21 = arith.constant dense<0.000000e+00> : vector<32x512xf32>
    %20 = tpu.matmul %18, %19, %cst_21 {dimension_numbers = #tpu.dot_dimension_numbers<[1], [0], [0], [1], [0, 0, 1, 1], [], []>} : vector<32x120xbf16>, vector<120x512xbf16>, vector<32x512xf32> -> vector<32x512xf32>
    %c0_22 = arith.constant 0 : index
    %c0_23 = arith.constant 0 : index
    %21 = vector.load %arg9[%c0_22, %c0_23] : memref<32x1xf32, #tpu.memory_space<vmem>>, vector<32x1xf32>
    %22 = vector.broadcast %21 : vector<32x1xf32> to vector<32x512xf32>
    %23 = arith.addf %20, %22 : vector<32x512xf32>
    %cst_24 = arith.constant 0.000000e+00 : f32
    %24 = vector.broadcast %cst_24 : f32 to vector<32x512xf32>
    %25 = arith.maximumf %23, %24 : vector<32x512xf32>
    %26 = arith.truncf %25 : vector<32x512xf32> to vector<32x512xbf16>
    %c0_25 = arith.constant 0 : index
    %c0_26 = arith.constant 0 : index
    %27 = vector.load %arg10[%c0_25, %c0_26] : memref<128x32xbf16, #tpu.memory_space<vmem>>, vector<128x32xbf16>
    %cst_27 = arith.constant dense<0.000000e+00> : vector<128x512xf32>
    %28 = tpu.matmul %27, %26, %cst_27 {dimension_numbers = #tpu.dot_dimension_numbers<[1], [0], [0], [1], [0, 0, 1, 1], [], []>} : vector<128x32xbf16>, vector<32x512xbf16>, vector<128x512xf32> -> vector<128x512xf32>
    %29 = vector.extract_strided_slice %28 {offsets = [0, 0], sizes = [32, 512], strides = [1, 1]} : vector<128x512xf32> to vector<32x512xf32>
    %cst_28 = arith.constant dense<0.000000e+00> : vector<512xf32>
    %30 = vector.multi_reduction <add>, %29, %cst_28 [0] : vector<32x512xf32> to vector<512xf32>
    %31 = vector.shape_cast %30 : vector<512xf32> to vector<1x512xf32>
    %cst_29 = arith.constant 3.200000e+01 : f32
    %32 = vector.broadcast %cst_29 : f32 to vector<1x512xf32>
    %33 = arith.divf %31, %32 : vector<1x512xf32>
    %34 = vector.broadcast %33 : vector<1x512xf32> to vector<32x512xf32>
    %35 = arith.subf %29, %34 : vector<32x512xf32>
    %36 = arith.mulf %35, %35 : vector<32x512xf32>
    %cst_30 = arith.constant dense<0.000000e+00> : vector<512xf32>
    %37 = vector.multi_reduction <add>, %36, %cst_30 [0] : vector<32x512xf32> to vector<512xf32>
    %38 = vector.shape_cast %37 : vector<512xf32> to vector<1x512xf32>
    %cst_31 = arith.constant 3.200000e+01 : f32
    %39 = vector.broadcast %cst_31 : f32 to vector<1x512xf32>
    %40 = arith.divf %38, %39 : vector<1x512xf32>
    %cst_32 = arith.constant 9.99999974E-6 : f32
    %41 = vector.broadcast %cst_32 : f32 to vector<1x512xf32>
    %42 = arith.addf %40, %41 : vector<1x512xf32>
    %43 = math.rsqrt %42 : vector<1x512xf32>
    %44 = vector.broadcast %43 : vector<1x512xf32> to vector<32x512xf32>
    %45 = arith.mulf %35, %44 : vector<32x512xf32>
    %46 = arith.truncf %45 : vector<32x512xf32> to vector<32x512xbf16>
    %47 = vector.extract_strided_slice %28 {offsets = [32, 0], sizes = [32, 512], strides = [1, 1]} : vector<128x512xf32> to vector<32x512xf32>
    %cst_33 = arith.constant dense<0.000000e+00> : vector<512xf32>
    %48 = vector.multi_reduction <add>, %47, %cst_33 [0] : vector<32x512xf32> to vector<512xf32>
    %49 = vector.shape_cast %48 : vector<512xf32> to vector<1x512xf32>
    %cst_34 = arith.constant 3.200000e+01 : f32
    %50 = vector.broadcast %cst_34 : f32 to vector<1x512xf32>
    %51 = arith.divf %49, %50 : vector<1x512xf32>
    %52 = vector.broadcast %51 : vector<1x512xf32> to vector<32x512xf32>
    %53 = arith.subf %47, %52 : vector<32x512xf32>
    %54 = arith.mulf %53, %53 : vector<32x512xf32>
    %cst_35 = arith.constant dense<0.000000e+00> : vector<512xf32>
    %55 = vector.multi_reduction <add>, %54, %cst_35 [0] : vector<32x512xf32> to vector<512xf32>
    %56 = vector.shape_cast %55 : vector<512xf32> to vector<1x512xf32>
    %cst_36 = arith.constant 3.200000e+01 : f32
    %57 = vector.broadcast %cst_36 : f32 to vector<1x512xf32>
    %58 = arith.divf %56, %57 : vector<1x512xf32>
    %cst_37 = arith.constant 9.99999974E-6 : f32
    %59 = vector.broadcast %cst_37 : f32 to vector<1x512xf32>
    %60 = arith.addf %58, %59 : vector<1x512xf32>
    %61 = math.rsqrt %60 : vector<1x512xf32>
    %62 = vector.broadcast %61 : vector<1x512xf32> to vector<32x512xf32>
    %63 = arith.mulf %53, %62 : vector<32x512xf32>
    %64 = arith.truncf %63 : vector<32x512xf32> to vector<32x512xbf16>
    %65 = vector.extract_strided_slice %28 {offsets = [64, 0], sizes = [32, 512], strides = [1, 1]} : vector<128x512xf32> to vector<32x512xf32>
    %cst_38 = arith.constant dense<0.000000e+00> : vector<512xf32>
    %66 = vector.multi_reduction <add>, %65, %cst_38 [0] : vector<32x512xf32> to vector<512xf32>
    %67 = vector.shape_cast %66 : vector<512xf32> to vector<1x512xf32>
    %cst_39 = arith.constant 3.200000e+01 : f32
    %68 = vector.broadcast %cst_39 : f32 to vector<1x512xf32>
    %69 = arith.divf %67, %68 : vector<1x512xf32>
    %70 = vector.broadcast %69 : vector<1x512xf32> to vector<32x512xf32>
    %71 = arith.subf %65, %70 : vector<32x512xf32>
    %72 = arith.mulf %71, %71 : vector<32x512xf32>
    %cst_40 = arith.constant dense<0.000000e+00> : vector<512xf32>
    %73 = vector.multi_reduction <add>, %72, %cst_40 [0] : vector<32x512xf32> to vector<512xf32>
    %74 = vector.shape_cast %73 : vector<512xf32> to vector<1x512xf32>
    %cst_41 = arith.constant 3.200000e+01 : f32
    %75 = vector.broadcast %cst_41 : f32 to vector<1x512xf32>
    %76 = arith.divf %74, %75 : vector<1x512xf32>
    %cst_42 = arith.constant 9.99999974E-6 : f32
    %77 = vector.broadcast %cst_42 : f32 to vector<1x512xf32>
    %78 = arith.addf %76, %77 : vector<1x512xf32>
    %79 = math.rsqrt %78 : vector<1x512xf32>
    %80 = vector.broadcast %79 : vector<1x512xf32> to vector<32x512xf32>
    %81 = arith.mulf %71, %80 : vector<32x512xf32>
    %82 = arith.truncf %81 : vector<32x512xf32> to vector<32x512xbf16>
    %83 = vector.extract_strided_slice %28 {offsets = [96, 0], sizes = [32, 512], strides = [1, 1]} : vector<128x512xf32> to vector<32x512xf32>
    %cst_43 = arith.constant dense<0.000000e+00> : vector<512xf32>
    %84 = vector.multi_reduction <add>, %83, %cst_43 [0] : vector<32x512xf32> to vector<512xf32>
    %85 = vector.shape_cast %84 : vector<512xf32> to vector<1x512xf32>
    %cst_44 = arith.constant 3.200000e+01 : f32
    %86 = vector.broadcast %cst_44 : f32 to vector<1x512xf32>
    %87 = arith.divf %85, %86 : vector<1x512xf32>
    %88 = vector.broadcast %87 : vector<1x512xf32> to vector<32x512xf32>
    %89 = arith.subf %83, %88 : vector<32x512xf32>
    %90 = arith.mulf %89, %89 : vector<32x512xf32>
    %cst_45 = arith.constant dense<0.000000e+00> : vector<512xf32>
    %91 = vector.multi_reduction <add>, %90, %cst_45 [0] : vector<32x512xf32> to vector<512xf32>
    %92 = vector.shape_cast %91 : vector<512xf32> to vector<1x512xf32>
    %cst_46 = arith.constant 3.200000e+01 : f32
    %93 = vector.broadcast %cst_46 : f32 to vector<1x512xf32>
    %94 = arith.divf %92, %93 : vector<1x512xf32>
    %cst_47 = arith.constant 9.99999974E-6 : f32
    %95 = vector.broadcast %cst_47 : f32 to vector<1x512xf32>
    %96 = arith.addf %94, %95 : vector<1x512xf32>
    %97 = math.rsqrt %96 : vector<1x512xf32>
    %98 = vector.broadcast %97 : vector<1x512xf32> to vector<32x512xf32>
    %99 = arith.mulf %89, %98 : vector<32x512xf32>
    %100 = arith.truncf %99 : vector<32x512xf32> to vector<32x512xbf16>
    %101 = tpu.concatenate %46, %64, %82, %100 in 0 : vector<32x512xbf16>, vector<32x512xbf16>, vector<32x512xbf16>, vector<32x512xbf16> -> vector<128x512xbf16>
    %c0_48 = arith.constant 0 : index
    %c0_49 = arith.constant 0 : index
    %102 = vector.load %arg11[%c0_48, %c0_49] : memref<32x128xbf16, #tpu.memory_space<vmem>>, vector<32x128xbf16>
    %cst_50 = arith.constant dense<0.000000e+00> : vector<32x512xf32>
    %103 = tpu.matmul %102, %101, %cst_50 {dimension_numbers = #tpu.dot_dimension_numbers<[1], [0], [0], [1], [0, 0, 1, 1], [], []>} : vector<32x128xbf16>, vector<128x512xbf16>, vector<32x512xf32> -> vector<32x512xf32>
    %c0_51 = arith.constant 0 : index
    %c0_52 = arith.constant 0 : index
    %104 = vector.load %arg12[%c0_51, %c0_52] : memref<32x1xf32, #tpu.memory_space<vmem>>, vector<32x1xf32>
    %105 = vector.broadcast %104 : vector<32x1xf32> to vector<32x512xf32>
    %106 = arith.addf %103, %105 : vector<32x512xf32>
    %c0_53 = arith.constant 0 : index
    %c0_54 = arith.constant 0 : index
    %c0_55 = arith.constant 0 : index
    %107 = vector.load %arg13[%c0_53, %c0_54, %c0_55] : memref<1x32x512xf32, #tpu.memory_space<vmem>>, vector<1x32x512xf32>
    %108 = vector.shape_cast %107 : vector<1x32x512xf32> to vector<32x512xf32>
    %109 = vector.shape_cast %106 : vector<32x512xf32> to vector<1x32x512xf32>
    tpu.vector_store %arg13[%c0_53, %c0_54, %c0_55], %109 {strides = array<i32>} : memref<1x32x512xf32, #tpu.memory_space<vmem>>, vector<1x32x512xf32>,
    return
  }
  func.func @transform_0(%arg0: i32) -> (i32, i32, i32) {
    %c0_i32 = arith.constant 0 : i32
    %c0_i32_0 = arith.constant 0 : i32
    %c0_i32_1 = arith.constant 0 : i32
    return %arg0, %c0_i32, %c0_i32_0 : i32, i32, i32
  }
  func.func @transform_1(%arg0: i32) -> (i32, i32, i32) {
    %c0_i32 = arith.constant 0 : i32
    %c0_i32_0 = arith.constant 0 : i32
    %c0_i32_1 = arith.constant 0 : i32
    return %arg0, %c0_i32, %c0_i32_0 : i32, i32, i32
  }
  func.func @transform_2(%arg0: i32) -> (i32, i32, i32) {
    %c0_i32 = arith.constant 0 : i32
    %c0_i32_0 = arith.constant 0 : i32
    %c0_i32_1 = arith.constant 0 : i32
    return %arg0, %c0_i32, %c0_i32_0 : i32, i32, i32
  }
  func.func @transform_3(%arg0: i32) -> (i32, i32, i32) {
    %c0_i32 = arith.constant 0 : i32
    %c0_i32_0 = arith.constant 0 : i32
    %c0_i32_1 = arith.constant 0 : i32
    return %arg0, %c0_i32, %c0_i32_0 : i32, i32, i32
  }
  func.func @transform_4(%arg0: i32) -> (i32, i32) {
    %c0_i32 = arith.constant 0 : i32
    %c0_i32_0 = arith.constant 0 : i32
    %c0_i32_1 = arith.constant 0 : i32
    return %c0_i32, %c0_i32_0 : i32, i32
  }
  func.func @transform_5(%arg0: i32) -> (i32, i32) {
    %c0_i32 = arith.constant 0 : i32
    %c0_i32_0 = arith.constant 0 : i32
    %c0_i32_1 = arith.constant 0 : i32
    return %c0_i32, %c0_i32_0 : i32, i32
  }
  func.func @transform_6(%arg0: i32) -> (i32, i32) {
    %c0_i32 = arith.constant 0 : i32
    %c0_i32_0 = arith.constant 0 : i32
    %c0_i32_1 = arith.constant 0 : i32
    return %c0_i32, %c0_i32_0 : i32, i32
  }
  func.func @transform_7(%arg0: i32) -> (i32, i32) {
    %c0_i32 = arith.constant 0 : i32
    %c0_i32_0 = arith.constant 0 : i32
    %c0_i32_1 = arith.constant 0 : i32
    return %c0_i32, %c0_i32_0 : i32, i32
  }
  func.func @transform_8(%arg0: i32) -> (i32, i32) {
    %c0_i32 = arith.constant 0 : i32
    %c0_i32_0 = arith.constant 0 : i32
    %c0_i32_1 = arith.constant 0 : i32
    return %c0_i32, %c0_i32_0 : i32, i32
  }
  func.func @transform_9(%arg0: i32) -> (i32, i32) {
    %c0_i32 = arith.constant 0 : i32
    %c0_i32_0 = arith.constant 0 : i32
    %c0_i32_1 = arith.constant 0 : i32
    return %c0_i32, %c0_i32_0 : i32, i32
  }
  func.func @transform_10(%arg0: i32) -> (i32, i32) {
    %c0_i32 = arith.constant 0 : i32
    %c0_i32_0 = arith.constant 0 : i32
    %c0_i32_1 = arith.constant 0 : i32
    return %c0_i32, %c0_i32_0 : i32, i32
  }
  func.func @transform_11(%arg0: i32) -> (i32, i32) {
    %c0_i32 = arith.constant 0 : i32
    %c0_i32_0 = arith.constant 0 : i32
    %c0_i32_1 = arith.constant 0 : i32
    return %c0_i32, %c0_i32_0 : i32, i32
  }
  func.func @transform_12(%arg0: i32) -> (i32, i32, i32) {
    %c0_i32 = arith.constant 0 : i32
    %c0_i32_0 = arith.constant 0 : i32
    %c0_i32_1 = arith.constant 0 : i32
    return %arg0, %c0_i32, %c0_i32_0 : i32, i32, i32
  }
}

</mosaic_0001>

<bundles_post_ra>
// kernel: tpu_custom_call.1
= control target key start
LH: loop header
LB: loop body
LE: loop exit
PB: predicated region body
PF: predicated region fallthrough
CT: control target
= control target key end

     0   :  { %17 = vsyncpa [#allocation3], 0  ;;  %s3806_s0 = inlined_call_operand.vmem [shape: f32[1,8,512], index: 0, kind: input, shape index: {}]   ;;  %s3807_s1 = inlined_call_operand.vmem [shape: f32[1,16,128], index: 1, kind: input, shape index: {}]   ;;  %s3808_s2 = inlined_call_operand.vmem [shape: f32[1,32,32], index: 2, kind: input, shape index: {}]   ;;  %s3809_s3 = inlined_call_operand.vmem [shape: f32[1,64,8], index: 3, kind: input, shape index: {}]   ;;  %s3810_s4 = inlined_call_operand.hbm [shape: bf16[128,512], index: 4, kind: input, shape index: {}]   ;;  %s3811_s5 = inlined_call_operand.vmem [shape: bf16[32,512], index: 5, kind: input, shape index: {}]   ;;  %s3812_s6 = inlined_call_operand.vmem [shape: bf16[8,512], index: 6, kind: input, shape index: {}]   ;;  %s3813_s7 = inlined_call_operand.vmem [shape: bf16[32,120], index: 7, kind: input, shape index: {}]   ;;  %s3814_s8 = inlined_call_operand.vmem [shape: f32[32,1], index: 8, kind: input, shape index: {}]   ;;  %s3815_s9 = inlined_call_operand.vmem [shape: bf16[128,32], index: 9, kind: input, shape index: {}]   ;;  %s3816_s10 = inlined_call_operand.vmem [shape: bf16[32,128], index: 10, kind: input, shape index: {}]   ;;  %s3817_s11 = inlined_call_operand.vmem [shape: f32[32,1], index: 11, kind: input, shape index: {}]   ;;  %s3818_s12 = inlined_call_operand.hbm [shape: f32[1,32,512], index: 12, kind: output, shape index: {}]  }
   0x1   :  { %18 = vsyncpa [#allocation4], 0  ;;  %s31_s23 = sshll.u32 %s3810_s4, 4  ;;  %s2541_s24 = smov [#allocation2]   ;;  %s32_s23 = int_to_ptr.hbm [resolvable:$true] %s31_s23 }
   0x2   :  { %s33_s25 = sshll.u32 %s2541_s24, 4  ;;  %s2542_s26 = smov 256   ;;  %s34_s25 = int_to_ptr.vmem [resolvable:$true] %s33_s25 }
   0x3   :  { %s2543_s27 = smov 16  }
   0x4   :  { %39 = dma.hbm_to_vmem [thread:$0]  %s32_s23, 4096, %s34_s25, [#allocation3], %s2542_s26, %s2542_s26, %s2543_s27  }
   0x5   :  { %2537 = dma.done.wait [#allocation3], 4096  }
   0x6   :  { %2538 = vsyncadd [#allocation3], 4294963200  ;;  %v2234_v0 = vld [vmem:[#allocation2 + $0xe0] sm:$0xf]  ;;  %v2422_v1 = vld [vmem:[#allocation2 + $0xec] sm:$0xf0] }
   0x7   :  { %v2420_v2 = vld [vmem:[#allocation2 + $0xe4] sm:$0xf]  ;;  %v2235_v3 = vor.u32 %v2422_v1, %v2234_v0  ;;  %v2236_v4 = vld [vmem:[#allocation2 + $0xf0] sm:$0xf0]  ;;  %v2242_v5 = vld [vmem:[#allocation2 + $0xe8] sm:$0xf] }
   0x8   :  { %v2423_v6 = vld [vmem:[#allocation2 + $0xf4] sm:$0xf0]  ;;  %v2239_v7 = vor.u32 %v2420_v2, %v2236_v4  ;;  %v2421_v9 = vld [vmem:[#allocation2 + $0xec] sm:$0xf]  ;;  %v2244_v10 = vld [vmem:[#allocation2 + $0xf8] sm:$0xf0] }
   0x9   :  { %v2243_v8 = vor.u32 %v2423_v6, %v2242_v5  ;;  %v2218_v11 = vld [vmem:[#allocation2 + $0xc0] sm:$0xf]  ;;  %258 = vmatpush.bf16.msra.mxu0 %v2235_v3  ;;  %v2247_v12 = vor.u32 %v2421_v9, %v2244_v10  ;;  %v2418_v13 = vld [vmem:[#allocation2 + $0xcc] sm:$0xf0]  ;;  %v2416_v14 = vld [vmem:[#allocation2 + $0xc4] sm:$0xf] }
   0xa   :  { %v2220_v15 = vld [vmem:[#allocation2 + $0xd0] sm:$0xf0]  ;;  %272 = vmatpush.bf16.msra.mxu1 %v2239_v7  ;;  %v2219_v16 = vor.u32 %v2418_v13, %v2218_v11  ;;  %v2226_v18 = vld [vmem:[#allocation2 + $0xc8] sm:$0xf]  ;;  %v2419_v19 = vld [vmem:[#allocation2 + $0xd4] sm:$0xf0] }
   0xb   :  { %286 = vmatpush.bf16.msra.mxu2 %v2243_v8  ;;  %v2223_v17 = vor.u32 %v2416_v14, %v2220_v15  ;;  %v2417_v20 = vld [vmem:[#allocation2 + $0xcc] sm:$0xf]  ;;  %300 = vmatpush.bf16.msra.mxu3 %v2247_v12  ;;  %v2227_v21 = vor.u32 %v2419_v19, %v2226_v18  ;;  %v2228_v22 = vld [vmem:[#allocation2 + $0xd8] sm:$0xf0]  ;;  %v2202_v23 = vld [vmem:[#allocation2 + $0xa0] sm:$0xf] }
   0xc   :  { %v2414_v24 = vld [vmem:[#allocation2 + $0xac] sm:$0xf0]  ;;  %v2231_v25 = vor.u32 %v2417_v20, %v2228_v22  ;;  %v2412_v26 = vld [vmem:[#allocation2 + $0xa4] sm:$0xf]  ;;  %v2204_v27 = vld [vmem:[#allocation2 + $0xb0] sm:$0xf0] }
   0xd   :  { %v2210_v28 = vld [vmem:[#allocation2 + $0xa8] sm:$0xf]  ;;  %259 = vmatpush.bf16.msra.mxu0 %v2219_v16  ;;  %v2203_v29 = vor.u32 %v2414_v24, %v2202_v23  ;;  %v2415_v30 = vld [vmem:[#allocation2 + $0xb4] sm:$0xf0]  ;;  %v2413_v31 = vld [vmem:[#allocation2 + $0xac] sm:$0xf]  ;;  %v2207_v33 = vor.u32 %v2412_v26, %v2204_v27 }
   0xe   :  { %v2212_v32 = vld [vmem:[#allocation2 + $0xb8] sm:$0xf0]  ;;  %273 = vmatpush.bf16.msra.mxu1 %v2223_v17  ;;  %v2211_v34 = vor.u32 %v2415_v30, %v2210_v28  ;;  %v2186_v35 = vld [vmem:[#allocation2 + $0x80] sm:$0xf]  ;;  %v2410_v36 = vld [vmem:[#allocation2 + $0x8c] sm:$0xf0] }
   0xf   :  { %287 = vmatpush.bf16.msra.mxu2 %v2227_v21  ;;  %v2408_v37 = vld [vmem:[#allocation2 + $0x84] sm:$0xf]  ;;  %301 = vmatpush.bf16.msra.mxu3 %v2231_v25  ;;  %v2215_v38 = vor.u32 %v2413_v31, %v2212_v32  ;;  %v2188_v39 = vld [vmem:[#allocation2 + $0x90] sm:$0xf0]  ;;  %v2194_v40 = vld [vmem:[#allocation2 + $0x88] sm:$0xf]  ;;  %v2187_v44 = vor.u32 %v2410_v36, %v2186_v35 }
  0x10   :  { %v2411_v41 = vld [vmem:[#allocation2 + $0x94] sm:$0xf0]  ;;  %v2409_v42 = vld [vmem:[#allocation2 + $0x8c] sm:$0xf]  ;;  %v2196_v43 = vld [vmem:[#allocation2 + $0x98] sm:$0xf0]  ;;  %v2191_v45 = vor.u32 %v2408_v37, %v2188_v39 }
  0x11   :  { %260 = vmatpush.bf16.msra.mxu0 %v2203_v29  ;;  %v2195_v46 = vor.u32 %v2411_v41, %v2194_v40  ;;  %v2170_v47 = vld [vmem:[#allocation2 + $0x60] sm:$0xf]  ;;  %v2406_v48 = vld [vmem:[#allocation2 + $0x6c] sm:$0xf0]  ;;  %v2404_v49 = vld [vmem:[#allocation2 + $0x64] sm:$0xf]  ;;  %v2199_v50 = vor.u32 %v2409_v42, %v2196_v43 }
  0x12   :  { %274 = vmatpush.bf16.msra.mxu1 %v2207_v33  ;;  %v2172_v51 = vld [vmem:[#allocation2 + $0x70] sm:$0xf0]  ;;  %v2178_v52 = vld [vmem:[#allocation2 + $0x68] sm:$0xf]  ;;  %v2407_v53 = vld [vmem:[#allocation2 + $0x74] sm:$0xf0]  ;;  %v2171_v56 = vor.u32 %v2406_v48, %v2170_v47 }
  0x13   :  { %288 = vmatpush.bf16.msra.mxu2 %v2211_v34  ;;  %302 = vmatpush.bf16.msra.mxu3 %v2215_v38  ;;  %v2405_v54 = vld [vmem:[#allocation2 + $0x6c] sm:$0xf]  ;;  %v2180_v55 = vld [vmem:[#allocation2 + $0x78] sm:$0xf0]  ;;  %v2175_v57 = vor.u32 %v2404_v49, %v2172_v51  ;;  %v2179_v58 = vor.u32 %v2407_v53, %v2178_v52  ;;  %v2154_v59 = vld [vmem:[#allocation2 + $0x40] sm:$0xf] }
  0x14   :  { %v2402_v60 = vld [vmem:[#allocation2 + $0x4c] sm:$0xf0]  ;;  %v2400_v61 = vld [vmem:[#allocation2 + $0x44] sm:$0xf]  ;;  %v2183_v62 = vor.u32 %v2405_v54, %v2180_v55  ;;  %v2156_v63 = vld [vmem:[#allocation2 + $0x50] sm:$0xf0] }
  0x15   :  { %261 = vmatpush.bf16.msra.mxu0 %v2187_v44  ;;  %v2162_v0 = vld [vmem:[#allocation2 + $0x48] sm:$0xf]  ;;  %v2403_v1 = vld [vmem:[#allocation2 + $0x54] sm:$0xf0]  ;;  %v2401_v2 = vld [vmem:[#allocation2 + $0x4c] sm:$0xf]  ;;  %v2155_v4 = vor.u32 %v2402_v60, %v2154_v59  ;;  %v2159_v5 = vor.u32 %v2400_v61, %v2156_v63 }
  0x16   :  { %275 = vmatpush.bf16.msra.mxu1 %v2191_v45  ;;  %v2164_v3 = vld [vmem:[#allocation2 + $0x58] sm:$0xf0]  ;;  %v2163_v6 = vor.u32 %v2403_v1, %v2162_v0  ;;  %v2138_v7 = vld [vmem:[#allocation2 + $0x20] sm:$0xf]  ;;  %v2398_v8 = vld [vmem:[#allocation2 + $0x2c] sm:$0xf0] }
  0x17   :  { %289 = vmatpush.bf16.msra.mxu2 %v2195_v46  ;;  %303 = vmatpush.bf16.msra.mxu3 %v2199_v50  ;;  %v2396_v9 = vld [vmem:[#allocation2 + $0x24] sm:$0xf]  ;;  %v2167_v10 = vor.u32 %v2401_v2, %v2164_v3  ;;  %v2140_v11 = vld [vmem:[#allocation2 + $0x30] sm:$0xf0]  ;;  %v2146_v12 = vld [vmem:[#allocation2 + $0x28] sm:$0xf]  ;;  %v2139_v16 = vor.u32 %v2398_v8, %v2138_v7 }
  0x18   :  { %v2399_v13 = vld [vmem:[#allocation2 + $0x34] sm:$0xf0]  ;;  %v2397_v14 = vld [vmem:[#allocation2 + $0x2c] sm:$0xf]  ;;  %v2148_v15 = vld [vmem:[#allocation2 + $0x38] sm:$0xf0]  ;;  %v2143_v19 = vor.u32 %v2396_v9, %v2140_v11 }
  0x19   :  { %262 = vmatpush.bf16.msra.mxu0 %v2171_v56  ;;  %v2122_v17 = vld [vmem:[#allocation2] sm:$0xf]  ;;  %v2394_v18 = vld [vmem:[#allocation2 + $0xc] sm:$0xf0]  ;;  %v2147_v20 = vor.u32 %v2399_v13, %v2146_v12  ;;  %v2392_v21 = vld [vmem:[#allocation2 + $0x4] sm:$0xf]  ;;  %v2151_v24 = vor.u32 %v2397_v14, %v2148_v15 }
  0x1a   :  { %276 = vmatpush.bf16.msra.mxu1 %v2175_v57  ;;  %v2124_v22 = vld [vmem:[#allocation2 + $0x10] sm:$0xf0]  ;;  %v2130_v23 = vld [vmem:[#allocation2 + $0x8] sm:$0xf]  ;;  %v2395_v25 = vld [vmem:[#allocation2 + $0x14] sm:$0xf0]  ;;  %v2123_v31 = vor.u32 %v2394_v18, %v2122_v17 }
  0x1b   :  { %290 = vmatpush.bf16.msra.mxu2 %v2179_v58  ;;  %304 = vmatpush.bf16.msra.mxu3 %v2183_v62  ;;  %v2393_v26 = vld [vmem:[#allocation2 + $0xc] sm:$0xf]  ;;  %v2132_v27 = vld [vmem:[#allocation2 + $0x18] sm:$0xf0]  ;;  %v63_v28 = vld [vmem:[%s3807_s1] sm:$0xff]  ;;  %v2127_v35 = vor.u32 %v2392_v21, %v2124_v22  ;;  %v2131_v36 = vor.u32 %v2395_v25, %v2130_v23  ;;  %vm488_vm0 = vcmask 1043456  }
  0x1c   :  { %v2266_v29 = vld [vmem:[%s3811_s5 + $0x20] sm:$0xf]  ;;  %v2430_v30 = vld [vmem:[%s3811_s5 + $0x2c] sm:$0xf0]  ;;  %v64_v32 = vld [vmem:[%s3807_s1 + $0x8] sm:$0xff]  ;;  %v2135_v37 = vor.u32 %v2393_v26, %v2132_v27  ;;  %vm368_vm1 = vcmask 261120  }
  0x1d   :  { %263 = vmatpush.bf16.msra.mxu0 %v2155_v4  ;;  %v2428_v33 = vld [vmem:[%s3811_s5 + $0x24] sm:$0xf]  ;;  %v2268_v34 = vld [vmem:[%s3811_s5 + $0x30] sm:$0xf0]  ;;  %v2267_v38 = vor.u32 %v2430_v30, %v2266_v29  ;;  %v2274_v39 = vld [vmem:[%s3811_s5 + $0x28] sm:$0xf]  ;;  %v65_v42 = vpack.c.bf16 %v64_v32, %v63_v28 }
  0x1e   :  { %277 = vmatpush.bf16.msra.mxu1 %v2159_v5  ;;  %v2431_v40 = vld [vmem:[%s3811_s5 + $0x34] sm:$0xf0]  ;;  %v2429_v41 = vld [vmem:[%s3811_s5 + $0x2c] sm:$0xf]  ;;  %v2271_v43 = vor.u32 %v2428_v33, %v2268_v34  ;;  %v2276_v44 = vld [vmem:[%s3811_s5 + $0x38] sm:$0xf0] }
  0x1f   :  { %291 = vmatpush.bf16.msra.mxu2 %v2163_v6  ;;  %305 = vmatpush.bf16.msra.mxu3 %v2167_v10  ;;  %v2250_v45 = vld [vmem:[%s3811_s5] sm:$0xf]  ;;  %v2426_v46 = vld [vmem:[%s3811_s5 + $0xc] sm:$0xf0]  ;;  %v2424_v47 = vld [vmem:[%s3811_s5 + $0x4] sm:$0xf]  ;;  %v2275_v49 = vor.u32 %v2431_v40, %v2274_v39  ;;  %v2279_v51 = vor.u32 %v2429_v41, %v2276_v44 }
  0x20   :  { %v2252_v48 = vld [vmem:[%s3811_s5 + $0x10] sm:$0xf0]  ;;  %v2258_v50 = vld [vmem:[%s3811_s5 + $0x8] sm:$0xf]  ;;  %v2251_v52 = vor.u32 %v2426_v46, %v2250_v45  ;;  %v2427_v53 = vld [vmem:[%s3811_s5 + $0x14] sm:$0xf0] }
  0x21   :  { %264 = vmatpush.bf16.msra.mxu0 %v2139_v16  ;;  %v2425_v54 = vld [vmem:[%s3811_s5 + $0xc] sm:$0xf]  ;;  %v2260_v55 = vld [vmem:[%s3811_s5 + $0x18] sm:$0xf0]  ;;  %v2255_v56 = vor.u32 %v2424_v47, %v2252_v48  ;;  %v2259_v57 = vor.u32 %v2427_v53, %v2258_v50  ;;  %v463_v59 = vld [vmem:[%s3812_s6] sm:$0xff]  ;;  %vm475_vm2 = vcmask 64512  }
  0x22   :  { %278 = vmatpush.bf16.msra.mxu1 %v2143_v19  ;;  %v2263_v58 = vor.u32 %v2425_v54, %v2260_v55  ;;  %v464_v60 = vld [vmem:[%s3812_s6 + $0x8] sm:$0xff]  ;;  %v467_v61 = vunpack.c.l.b16 %v463_v59  ;;  %v468_v62 = vunpack.c.h.b16 %v463_v59  ;;  %v314_v9 = vld [vmem:[%s3808_s2] sm:$0xff]  ;;  %v316_v12 = vld [vmem:[%s3808_s2 + $0x10] sm:$0xff]  ;;  %vm687_vm3 = vcmask 982016   ;;  %s2107_s25 = sshll.u32 %s3818_s12, 4  ;;  %s2547_s26 = smov 512   ;;  %s2108_s25 = int_to_ptr.hbm [resolvable:$true] %s2107_s25 }
  0x23   :  { %292 = vmatpush.bf16.msra.mxu2 %v2147_v20  ;;  %306 = vmatpush.bf16.msra.mxu3 %v2151_v24  ;;  %v469_v63 = vunpack.c.l.b16 %v464_v60  ;;  %v470_v0 = vunpack.c.h.b16 %v464_v60  ;;  %v315_v10 = vld [vmem:[%s3808_s2 + $0x8] sm:$0xff]  ;;  %v317_v13 = vld [vmem:[%s3808_s2 + $0x18] sm:$0xff]  ;;  %v451_v15 = vld [vmem:[%s3809_s3] sm:$0xff] }
  0x24   :  { %v471_v1 = vpack.c.b16 %v467_v61, %v467_v61  ;;  %v472_v2 = vpack.c.b16 %v468_v62, %v468_v62  ;;  %v318_v11 = vpack.c.bf16 %v315_v10, %v314_v9  ;;  %v319_v14 = vpack.c.bf16 %v317_v13, %v316_v12  ;;  %v452_v16 = vld [vmem:[%s3809_s3 + $0x8] sm:$0xff]  ;;  %v453_v18 = vld [vmem:[%s3809_s3 + $0x10] sm:$0xff]  ;;  %v454_v19 = vld [vmem:[%s3809_s3 + $0x18] sm:$0xff] }
  0x25   :  { %265 = vmatpush.bf16.msra.mxu0 %v2123_v31  ;;  %v473_v3 = vpack.c.b16 %v469_v63, %v469_v63  ;;  %v474_v4 = vpack.c.b16 %v470_v0, %v470_v0  ;;  %v459_v17 = vpack.c.bf16 %v452_v16, %v451_v15  ;;  %v460_v20 = vpack.c.bf16 %v454_v19, %v453_v18  ;;  %v455_v21 = vld [vmem:[%s3809_s3 + $0x20] sm:$0xff]  ;;  %v456_v22 = vld [vmem:[%s3809_s3 + $0x28] sm:$0xff]  ;;  %v457_v24 = vld [vmem:[%s3809_s3 + $0x30] sm:$0xff] }
  0x26   :  { %279 = vmatpush.bf16.msra.mxu1 %v2127_v35  ;;  %v490_v5 = vsel %vm488_vm0, %v471_v1, 0  ;;  %v493_v6 = vsel %vm488_vm0, %v472_v2, 0  ;;  %v461_v23 = vpack.c.bf16 %v456_v22, %v455_v21  ;;  %v458_v25 = vld [vmem:[%s3809_s3 + $0x38] sm:$0xff] }
  0x27   :  { %293 = vmatpush.bf16.msra.mxu2 %v2131_v36  ;;  %307 = vmatpush.bf16.msra.mxu3 %v2135_v37  ;;  %v496_v7 = vsel %vm488_vm0, %v473_v3, 0  ;;  %v499_v8 = vsel %vm488_vm0, %v474_v4, 0  ;;  %v462_v26 = vpack.c.bf16 %v458_v25, %v457_v24 }
  0x28   :  { %266 = vmatmul.bf16.vlgmr.msra.gmra.mxu0 %v65_v42 }
  0x29   :  { %381 = vmatpush.bf16.msrb.mxu0 %v2267_v38  ;;  %280 = vmatmul.bf16.vlgmr.msra.gmra.mxu1 %v65_v42 }
  0x2a   :  { %400 = vmatpush.bf16.msrb.mxu1 %v2271_v43  ;;  %294 = vmatmul.bf16.vlgmr.msra.gmra.mxu2 %v65_v42 }
  0x2b   :  { %308 = vmatmul.bf16.vlgmr.msra.gmra.mxu3 %v65_v42  ;;  %419 = vmatpush.bf16.msrb.mxu2 %v2275_v49 }
  0x2c   :  { %438 = vmatpush.bf16.msrb.mxu3 %v2279_v51 }
  0x2d   :  { %382 = vmatpush.bf16.msrb.mxu0 %v2251_v52 }
  0x2e   :  { %401 = vmatpush.bf16.msrb.mxu1 %v2255_v56 }
  0x2f   :  { %420 = vmatpush.bf16.msrb.mxu2 %v2259_v57 }
  0x30   :  { %439 = vmatpush.bf16.msrb.mxu3 %v2263_v58 }
  0x31   :  { %508 = vmatpush.bf16.msra.mxu0 %v490_v5 }
  0x32   :  { %537 = vmatpush.bf16.msra.mxu1 %v493_v6 }
  0x33   :  { %566 = vmatpush.bf16.msra.mxu2 %v496_v7 }
  0x34   :  { %595 = vmatpush.bf16.msra.mxu3 %v499_v8 }
  0x38   :  { %2280 = vmatmul.msk.bf16.vlgmr.msrb.gmra.mxu0 %vm368_vm1, %v318_v11 }
  0x39   :  { %2282 = vmatmul.msk.bf16.vlgmr.msrb.gmra.mxu1 %vm368_vm1, %v318_v11 }
  0x3a   :  { %2284 = vmatmul.msk.bf16.vlgmr.msrb.gmra.mxu2 %vm368_vm1, %v318_v11 }
  0x3b   :  { %2286 = vmatmul.msk.bf16.vlgmr.msrb.gmra.mxu3 %vm368_vm1, %v318_v11 }
  0x48   :  { %2281 = vmatmul.msk.bf16.gmra.mxu0 %vm368_vm1, %v319_v14 }
  0x49   :  { %2283 = vmatmul.msk.bf16.gmra.mxu1 %vm368_vm1, %v319_v14 }
  0x4a   :  { %2285 = vmatmul.msk.bf16.gmra.mxu2 %vm368_vm1, %v319_v14 }
  0x4b   :  { %2287 = vmatmul.msk.bf16.gmra.mxu3 %vm368_vm1, %v319_v14 }
  0x58   :  { %2288 = vmatmul.msk.bf16.vlgmr.msra.gmra.mxu0 %vm475_vm2, %v459_v17 }
  0x59   :  { %2292 = vmatmul.msk.bf16.vlgmr.msra.gmra.mxu1 %vm475_vm2, %v459_v17 }
  0x5a   :  { %2296 = vmatmul.msk.bf16.vlgmr.msra.gmra.mxu2 %vm475_vm2, %v459_v17 }
  0x5b   :  { %2300 = vmatmul.msk.bf16.vlgmr.msra.gmra.mxu3 %vm475_vm2, %v459_v17 }
  0x68   :  { %2289 = vmatmul.msk.bf16.gmra.mxu0 %vm475_vm2, %v460_v20 }
  0x69   :  { %2293 = vmatmul.msk.bf16.gmra.mxu1 %vm475_vm2, %v460_v20 }
  0x6a   :  { %2297 = vmatmul.msk.bf16.gmra.mxu2 %vm475_vm2, %v460_v20 }
  0x6b   :  { %2301 = vmatmul.msk.bf16.gmra.mxu3 %vm475_vm2, %v460_v20 }
  0x78   :  { %2290 = vmatmul.msk.bf16.gmra.mxu0 %vm475_vm2, %v461_v23 }
  0x79   :  { %2294 = vmatmul.msk.bf16.gmra.mxu1 %vm475_vm2, %v461_v23 }
  0x7a   :  { %2298 = vmatmul.msk.bf16.gmra.mxu2 %vm475_vm2, %v461_v23 }
  0x7b   :  { %2302 = vmatmul.msk.bf16.gmra.mxu3 %vm475_vm2, %v461_v23 }
  0x88   :  { %2291 = vmatmul.msk.bf16.gmra.mxu0 %vm475_vm2, %v462_v26 }
  0x89   :  { %2295 = vmatmul.msk.bf16.gmra.mxu1 %vm475_vm2, %v462_v26 }
  0x8a   :  { %2299 = vmatmul.msk.bf16.gmra.mxu2 %vm475_vm2, %v462_v26 }
  0x8b   :  { %2303 = vmatmul.msk.bf16.gmra.mxu3 %vm475_vm2, %v462_v26 }
  0xa5   :  { %v2741_v27 = vpop.f32.mrf.mxu0 }
  0xa6   :  { %v2743_v28 = vpop.f32.mrf.mxu1 }
  0xad   :  { %v2745_v29 = vpop.f32.mrf.mxu2  ;;  %v2749_v31 = vpop.f32.mrf.mxu0 }
  0xae   :  { %3860 = vst [vmem:[#allocation8_spill] sm:$0xff] %v2745_v29  ;;  %v2747_v30 = vpop.f32.mrf.mxu3  ;;  %v2751_v32 = vpop.f32.mrf.mxu1 }
  0xaf   :  { %3861 = vst [vmem:[#allocation9_spill] sm:$0xff] %v2747_v30 }
  0xb5   :  { %v2753_v33 = vpop.f32.mrf.mxu2  ;;  %v2757_v35 = vpop.f32.mrf.mxu0 }
  0xb6   :  { %v2755_v34 = vpop.f32.mrf.mxu3  ;;  %v2759_v36 = vpop.f32.mrf.mxu1 }
  0xbd   :  { %v2761_v37 = vpop.f32.mrf.mxu2  ;;  %v2765_v39 = vpop.f32.mrf.mxu0 }
  0xbe   :  { %v2763_v38 = vpop.f32.mrf.mxu3  ;;  %v2767_v40 = vpop.f32.mrf.mxu1 }
  0xc5   :  { %v2769_v41 = vpop.f32.mrf.mxu2  ;;  %v2773_v43 = vpop.f32.mrf.mxu0 }
  0xc6   :  { %v2771_v42 = vpop.f32.mrf.mxu3  ;;  %v2775_v44 = vpop.f32.mrf.mxu1 }
  0xcd   :  { %v2777_v45 = vpop.f32.mrf.mxu2  ;;  %v2781_v47 = vpop.f32.mrf.mxu0 }
  0xce   :  { %v2779_v46 = vpop.f32.mrf.mxu3  ;;  %v2783_v48 = vpop.f32.mrf.mxu1 }
  0xd5   :  { %v2785_v49 = vpop.f32.mrf.mxu2  ;;  %v2789_v51 = vpop.f32.mrf.mxu0 }
  0xd6   :  { %v2787_v50 = vpop.f32.mrf.mxu3  ;;  %v2791_v52 = vpop.f32.mrf.mxu1 }
  0xdd   :  { %v2793_v53 = vpop.f32.mrf.mxu2  ;;  %v512_v55 = vpop.f32.mrf.mxu0 }
  0xde   :  { %v2795_v54 = vpop.f32.mrf.mxu3  ;;  %v541_v56 = vpop.f32.mrf.mxu1 }
  0xe5   :  { %v2797_v57 = vpop.f32.mrf.mxu2  ;;  %v515_v59 = vpop.f32.mrf.mxu0 }
  0xe6   :  { %v2799_v58 = vpop.f32.mrf.mxu3  ;;  %v544_v60 = vpop.f32.mrf.mxu1 }
  0xed   :  { %v2801_v61 = vpop.f32.mrf.mxu2  ;;  %v517_v63 = vpop.f32.mrf.mxu0 }
  0xee   :  { %v2803_v62 = vpop.f32.mrf.mxu3  ;;  %v546_v0 = vpop.f32.mrf.mxu1 }
  0xf5   :  { %v575_v1 = vpop.f32.mrf.mxu2  ;;  %v520_v3 = vpop.f32.mrf.mxu0 }
  0xf6   :  { %v604_v2 = vpop.f32.mrf.mxu3  ;;  %v549_v4 = vpop.f32.mrf.mxu1  ;;  %v641_v30 = vpack.c.bf16 %v520_v3, %v517_v63  ;;  %v633_v63 = vpack.c.bf16 %v2789_v51, %v2781_v47  ;;  %v630_v47 = vpack.c.bf16 %v2775_v44, %v2767_v40  ;;  %v625_v51 = vpack.c.bf16 %v2757_v35, %v2749_v31  ;;  %v655_v44 = vld [vmem:[%s3814_s8 + $0x10] sm:$0xff]  ;;  %v60_v31 = vld [vmem:[%s3806_s0 + $0x8] sm:$0xff] }
  0xf7   :  { %v626_v40 = vpack.c.bf16 %v2759_v36, %v2751_v32  ;;  %v631_v35 = vpack.c.bf16 %v2777_v45, %v2769_v41  ;;  %v632_v36 = vpack.c.bf16 %v2779_v46, %v2771_v42  ;;  %v627_v41 = vpack.c.bf16 %v2761_v37, %v2753_v33  ;;  %v62_v45 = vld [vmem:[%s3806_s0 + $0x18] sm:$0xff]  ;;  %v654_v33 = vld [vmem:[%s3814_s8 + $0x8] sm:$0xff]  ;;  %v3862_v37 = vld [vmem:[#allocation8_spill] sm:$0xff] }
  0xf8   :  { %v628_v42 = vpack.c.bf16 %v2763_v38, %v2755_v34  ;;  %v3863_v38 = vld [vmem:[#allocation9_spill] sm:$0xff] }
  0xf9   :  { %v624_v46 = vpack.c.bf16 %v3863_v38, %v62_v45 }
  0xfd   :  { %v578_v5 = vpop.f32.mrf.mxu2  ;;  %v522_v7 = vpop.f32.mrf.mxu0 }
  0xfe   :  { %v607_v6 = vpop.f32.mrf.mxu3  ;;  %v551_v8 = vpop.f32.mrf.mxu1 }
  0xff   :  { %v644_v3 = vpack.c.bf16 %v607_v6, %v604_v2 }
 0x105   :  { %v580_v9 = vpop.f32.mrf.mxu2  ;;  %v525_v11 = vpop.f32.mrf.mxu0 }
 0x106   :  { %v609_v10 = vpop.f32.mrf.mxu3  ;;  %v554_v12 = vpop.f32.mrf.mxu1  ;;  %v645_v21 = vpack.c.bf16 %v525_v11, %v522_v7  ;;  %v643_v11 = vpack.c.bf16 %v578_v5, %v575_v1 }
 0x107   :  { %v646_v22 = vpack.c.bf16 %v554_v12, %v551_v8  ;;  %v638_v8 = vpack.c.bf16 %v544_v60, %v541_v56  ;;  %v629_v56 = vpack.c.bf16 %v2773_v43, %v2765_v39  ;;  %v636_v39 = vpack.c.bf16 %v2795_v54, %v2787_v50  ;;  %v59_v43 = vld [vmem:[%s3806_s0] sm:$0xff]  ;;  %v1976_v54 = vld [vmem:[%s3817_s11 + $0x18] sm:$0xff] }
 0x108   :  { %v621_v32 = vpack.c.bf16 %v2741_v27, %v59_v43  ;;  %v622_v50 = vpack.c.bf16 %v2743_v28, %v60_v31  ;;  %v61_v27 = vld [vmem:[%s3806_s0 + $0x10] sm:$0xff]  ;;  %v656_v28 = vld [vmem:[%s3814_s8 + $0x18] sm:$0xff] }
 0x109   :  { %v623_v34 = vpack.c.bf16 %v3862_v37, %v61_v27 }
 0x10d   :  { %v583_v13 = vpop.f32.mrf.mxu2  ;;  %v527_v15 = vpop.f32.mrf.mxu0 }
 0x10e   :  { %v612_v14 = vpop.f32.mrf.mxu3  ;;  %v649_v16 = vpack.c.bf16 %v527_v15, %v527_v15  ;;  %v556_v17 = vpop.f32.mrf.mxu1  ;;  %v642_v15 = vpack.c.bf16 %v549_v4, %v546_v0 }
 0x10f   :  { %v650_v18 = vpack.c.bf16 %v556_v17, %v556_v17  ;;  %v648_v7 = vpack.c.bf16 %v612_v14, %v609_v10 }
 0x110   :  { %v695_v19 = vsel %vm488_vm0, %v649_v16, 0  ;;  %v647_v16 = vpack.c.bf16 %v583_v13, %v580_v9 }
 0x111   :  { %706 = vmatpush.bf16.msrb.mxu0 %v695_v19  ;;  %v698_v20 = vsel %vm488_vm0, %v650_v18, 0  ;;  %v637_v18 = vpack.c.bf16 %v515_v59, %v512_v55  ;;  %v2544_v55 = vmov 0   ;;  %v640_v59 = vpack.c.bf16 %v2803_v62, %v2799_v58 }
 0x112   :  { %725 = vmatpush.bf16.msrb.mxu1 %v698_v20  ;;  %2453 = vset.pattern.permute.xlu1 %v2544_v55 }
 0x113   :  { %2452 = vset.pattern.permute.xlu0 %v2544_v55  ;;  %2454 = vset.pattern.permute.xlu2 %v2544_v55 }
 0x114   :  { %669 = vperm.xlu0 %2452, %v655_v44  }
 0x115   :  { %v585_v23 = vpop.f32.mrf.mxu2  ;;  %707 = vmatpush.bf16.msrb.mxu0 %v645_v21 }
 0x116   :  { %v651_v24 = vpack.c.bf16 %v585_v23, %v585_v23  ;;  %v614_v25 = vpop.f32.mrf.mxu3  ;;  %726 = vmatpush.bf16.msrb.mxu1 %v646_v22 }
 0x117   :  { %v652_v26 = vpack.c.bf16 %v614_v25, %v614_v25 }
 0x118   :  { %v701_v29 = vsel %vm488_vm0, %v651_v24, 0 }
 0x119   :  { %744 = vmatpush.bf16.msrb.mxu2 %v701_v29  ;;  %v704_v17 = vsel %vm488_vm0, %v652_v26, 0  ;;  %708 = vmatpush.bf16.msrb.mxu0 %v641_v30  ;;  %v634_v29 = vpack.c.bf16 %v2791_v52, %v2783_v48  ;;  %v639_v30 = vpack.c.bf16 %v2801_v61, %v2797_v57  ;;  %v635_v48 = vpack.c.bf16 %v2793_v53, %v2785_v49  ;;  %v653_v49 = vld [vmem:[%s3814_s8] sm:$0xff]  ;;  %v1975_v53 = vld [vmem:[%s3817_s11 + $0x10] sm:$0xff]  ;;  %v2433_v57 = vld [vmem:[%s3813_s7 + $0x8] sm:$0xff] }
 0x11a   :  { %763 = vmatpush.bf16.msrb.mxu3 %v704_v17  ;;  %727 = vmatpush.bf16.msrb.mxu1 %v642_v15  ;;  %v2432_v52 = vld [vmem:[%s3813_s7] sm:$0xff]  ;;  %s2548_s7 = smov 32  }
 0x11b   :  { %659 = vperm.xlu1 %2453, %v653_v49  }
 0x11c   :  { %674 = vperm.xlu0 %2452, %v656_v28  }
 0x11d   :  { %745 = vmatpush.bf16.msrb.mxu2 %v647_v16  ;;  %709 = vmatpush.bf16.msrb.mxu0 %v637_v18 }
 0x11e   :  { %764 = vmatpush.bf16.msrb.mxu3 %v648_v7  ;;  %728 = vmatpush.bf16.msrb.mxu1 %v638_v8 }
 0x121   :  { %746 = vmatpush.bf16.msrb.mxu2 %v643_v11  ;;  %710 = vmatpush.bf16.msrb.mxu0 %v633_v63 }
 0x122   :  { %765 = vmatpush.bf16.msrb.mxu3 %v644_v3  ;;  %729 = vmatpush.bf16.msrb.mxu1 %v634_v29 }
 0x123   :  { %664 = vperm.xlu1 %2453, %v654_v33  }
 0x124   :  { %1989 = vperm.xlu0 %2452, %v1975_v53   ;;  %v2435_v53 = vld [vmem:[%s3815_s9 + $0x8] sm:$0xff] }
 0x125   :  { %747 = vmatpush.bf16.msrb.mxu2 %v639_v30  ;;  %711 = vmatpush.bf16.msrb.mxu0 %v629_v56 }
 0x126   :  { %766 = vmatpush.bf16.msrb.mxu3 %v640_v59  ;;  %730 = vmatpush.bf16.msrb.mxu1 %v630_v47 }
 0x129   :  { %748 = vmatpush.bf16.msrb.mxu2 %v635_v48  ;;  %712 = vmatpush.bf16.msrb.mxu0 %v625_v51  ;;  %v2434_v48 = vld [vmem:[%s3815_s9] sm:$0xff] }
 0x12a   :  { %767 = vmatpush.bf16.msrb.mxu3 %v636_v39  ;;  %731 = vmatpush.bf16.msrb.mxu1 %v626_v40 }
 0x12b   :  { %1994 = vperm.xlu1 %2453, %v1976_v54   ;;  %v2436_v54 = vld [vmem:[%s3815_s9 + $0x10] sm:$0xff] }
 0x12d   :  { %749 = vmatpush.bf16.msrb.mxu2 %v631_v35  ;;  %713 = vmatpush.bf16.msrb.mxu0 %v621_v32 }
 0x12e   :  { %768 = vmatpush.bf16.msrb.mxu3 %v632_v36  ;;  %732 = vmatpush.bf16.msrb.mxu1 %v622_v50 }
 0x130   :  { %2312 = vmatmul.msk.bf16.vlgmr.msrb.gmra.mxu0 %vm687_vm3, %v2432_v52 }
 0x131   :  { %750 = vmatpush.bf16.msrb.mxu2 %v627_v41  ;;  %2314 = vmatmul.msk.bf16.vlgmr.msrb.gmra.mxu1 %vm687_vm3, %v2432_v52 }
 0x132   :  { %769 = vmatpush.bf16.msrb.mxu3 %v628_v42 }
 0x135   :  { %751 = vmatpush.bf16.msrb.mxu2 %v623_v34 }
 0x136   :  { %770 = vmatpush.bf16.msrb.mxu3 %v624_v46 }
 0x138   :  { %2316 = vmatmul.msk.bf16.vlgmr.msrb.gmra.mxu2 %vm687_vm3, %v2432_v52 }
 0x139   :  { %2318 = vmatmul.msk.bf16.vlgmr.msrb.gmra.mxu3 %vm687_vm3, %v2432_v52 }
 0x140   :  { %2313 = vmatmul.msk.bf16.gmra.mxu0 %vm687_vm3, %v2433_v57 }
 0x141   :  { %2315 = vmatmul.msk.bf16.gmra.mxu1 %vm687_vm3, %v2433_v57 }
 0x148   :  { %2317 = vmatmul.msk.bf16.gmra.mxu2 %vm687_vm3, %v2433_v57 }
 0x149   :  { %2319 = vmatmul.msk.bf16.gmra.mxu3 %vm687_vm3, %v2433_v57  ;;  %v2437_v57 = vld [vmem:[%s3815_s9 + $0x18] sm:$0xff] }
 0x186   :  { %v670_v0 = vpop.permute.xlu0 %669 }
 0x18d   :  { %v660_v2 = vpop.permute.xlu1 %659 }
 0x18e   :  { %v675_v14 = vpop.permute.xlu0 %674 }
 0x195   :  { %v665_v19 = vpop.permute.xlu1 %664 }
 0x1ad   :  { %v715_v58 = vpop.f32.mrf.mxu0 }
 0x1ae   :  { %v734_v60 = vpop.f32.mrf.mxu1  ;;  %v716_v21 = vadd.f32 %v715_v58, %v660_v2  ;;  %v2438_v58 = vld [vmem:[%s3815_s9 + $0x20] sm:$0xff] }
 0x1af   :  { %v735_v26 = vadd.f32 %v734_v60, %v660_v2  ;;  %v2439_v60 = vld [vmem:[%s3815_s9 + $0x28] sm:$0xff] }
 0x1b0   :  { %v782_v63 = vmax.f32 %v716_v21, 0.0 }
 0x1b1   :  { %v783_v55 = vmax.f32 %v735_v26, 0.0 }
 0x1b5   :  { %v717_v61 = vpop.f32.mrf.mxu0 }
 0x1b6   :  { %v736_v62 = vpop.f32.mrf.mxu1  ;;  %v718_v23 = vadd.f32 %v717_v61, %v665_v19  ;;  %v2440_v61 = vld [vmem:[%s3815_s9 + $0x30] sm:$0xff] }
 0x1b7   :  { %v737_v17 = vadd.f32 %v736_v62, %v665_v19  ;;  %v2441_v62 = vld [vmem:[%s3815_s9 + $0x38] sm:$0xff] }
 0x1b8   :  { %v786_v3 = vmax.f32 %v718_v23, 0.0 }
 0x1b9   :  { %v787_v56 = vmax.f32 %v737_v17, 0.0 }
 0x1ba   :  { %v798_v59 = vpack.c.bf16 %v786_v3, %v782_v63 }
 0x1bb   :  { %v753_v1 = vpop.f32.mrf.mxu2  ;;  %v799_v47 = vpack.c.bf16 %v787_v56, %v783_v55 }
 0x1bc   :  { %v772_v4 = vpop.f32.mrf.mxu3  ;;  %v754_v32 = vadd.f32 %v753_v1, %v660_v2 }
 0x1bd   :  { %v720_v5 = vpop.f32.mrf.mxu0  ;;  %v773_v52 = vadd.f32 %v772_v4, %v660_v2 }
 0x1be   :  { %v739_v6 = vpop.f32.mrf.mxu1  ;;  %v721_v9 = vadd.f32 %v720_v5, %v670_v0  ;;  %v784_v37 = vmax.f32 %v754_v32, 0.0 }
 0x1bf   :  { %v740_v12 = vadd.f32 %v739_v6, %v670_v0  ;;  %v785_v34 = vmax.f32 %v773_v52, 0.0 }
 0x1c0   :  { %v790_v22 = vmax.f32 %v721_v9, 0.0  ;;  %v2545_v9 = vmov 32.0  }
 0x1c1   :  { %v791_v15 = vmax.f32 %v740_v12, 0.0  ;;  %2455 = vrcp.f32 %v2545_v9 }
 0x1c3   :  { %v755_v10 = vpop.f32.mrf.mxu2 }
 0x1c4   :  { %v774_v13 = vpop.f32.mrf.mxu3  ;;  %v756_v40 = vadd.f32 %v755_v10, %v665_v19 }
 0x1c5   :  { %v722_v20 = vpop.f32.mrf.mxu0  ;;  %v775_v31 = vadd.f32 %v774_v13, %v665_v19 }
 0x1c6   :  { %v723_v24 = vadd.f32 %v722_v20, %v675_v14  ;;  %v741_v25 = vpop.f32.mrf.mxu1  ;;  %v788_v42 = vmax.f32 %v756_v40, 0.0 }
 0x1c7   :  { %v742_v16 = vadd.f32 %v741_v25, %v675_v14  ;;  %v789_v45 = vmax.f32 %v775_v31, 0.0  ;;  %v2456_v12 = vpop.eup %2455 }
 0x1c8   :  { %v794_v18 = vmax.f32 %v723_v24, 0.0  ;;  %v800_v38 = vpack.c.bf16 %v788_v42, %v784_v37  ;;  %vm1123_vm4 = vweird.f32 %v2456_v12 }
 0x1c9   :  { %v795_v7 = vmax.f32 %v742_v16, 0.0  ;;  %v801_v46 = vpack.c.bf16 %v789_v45, %v785_v34 }
 0x1ca   :  { %v802_v8 = vpack.c.bf16 %v794_v18, %v790_v22  ;;  %v1119_v22 = vmul.f32 32.0, %v2456_v12 }
 0x1cb   :  { %v758_v11 = vpop.f32.mrf.mxu2  ;;  %v803_v29 = vpack.c.bf16 %v795_v7, %v791_v15 }
 0x1cc   :  { %v777_v30 = vpop.f32.mrf.mxu3  ;;  %892 = vmatpush.bf16.msra.mxu0 %v802_v8  ;;  %v759_v51 = vadd.f32 %v758_v11, %v670_v0  ;;  %v1120_v24 = vsub.f32 1.0, %v1119_v22 }
 0x1cd   :  { %941 = vmatpush.bf16.msra.mxu1 %v803_v29  ;;  %v778_v39 = vadd.f32 %v777_v30, %v670_v0 }
 0x1ce   :  { %v792_v36 = vmax.f32 %v759_v51, 0.0  ;;  %v1121_v18 = vmul.f32 %v2456_v12, %v1120_v24 }
 0x1cf   :  { %v793_v41 = vmax.f32 %v778_v39, 0.0 }
 0x1d0   :  { %893 = vmatpush.bf16.msra.mxu0 %v798_v59  ;;  %v1122_v55 = vadd.f32 %v2456_v12, %v1121_v18 }
 0x1d1   :  { %942 = vmatpush.bf16.msra.mxu1 %v799_v47 }
 0x1d2   :  { %v2959_v40 = vsel %vm1123_vm4, %v2456_v12, %v1122_v55 }
 0x1d3   :  { %v760_v43 = vpop.f32.mrf.mxu2  ;;  %2352 = vmatmul.msk.bf16.vlgmr.msra.gmra.mxu0 %vm368_vm1, %v2434_v48 }
 0x1d4   :  { %v761_v44 = vadd.f32 %v760_v43, %v675_v14  ;;  %v779_v49 = vpop.f32.mrf.mxu3  ;;  %2360 = vmatmul.msk.bf16.vlgmr.msra.gmra.mxu1 %vm368_vm1, %v2434_v48 }
 0x1d5   :  { %v780_v35 = vadd.f32 %v779_v49, %v675_v14 }
 0x1d6   :  { %v796_v50 = vmax.f32 %v761_v44, 0.0 }
 0x1d7   :  { %v797_v27 = vmax.f32 %v780_v35, 0.0 }
 0x1d8   :  { %v804_v28 = vpack.c.bf16 %v796_v50, %v792_v36 }
 0x1d9   :  { %v805_v33 = vpack.c.bf16 %v797_v27, %v793_v41 }
 0x1da   :  { %990 = vmatpush.bf16.msra.mxu2 %v804_v28 }
 0x1db   :  { %1039 = vmatpush.bf16.msra.mxu3 %v805_v33 }
 0x1de   :  { %991 = vmatpush.bf16.msra.mxu2 %v800_v38 }
 0x1df   :  { %1040 = vmatpush.bf16.msra.mxu3 %v801_v46 }
 0x1e1   :  { %2368 = vmatmul.msk.bf16.vlgmr.msra.gmra.mxu2 %vm368_vm1, %v2434_v48 }
 0x1e2   :  { %2376 = vmatmul.msk.bf16.vlgmr.msra.gmra.mxu3 %vm368_vm1, %v2434_v48 }
 0x1e3   :  { %2353 = vmatmul.msk.bf16.gmra.mxu0 %vm368_vm1, %v2435_v53 }
 0x1e4   :  { %2361 = vmatmul.msk.bf16.gmra.mxu1 %vm368_vm1, %v2435_v53 }
 0x1f1   :  { %2369 = vmatmul.msk.bf16.gmra.mxu2 %vm368_vm1, %v2435_v53 }
 0x1f2   :  { %2377 = vmatmul.msk.bf16.gmra.mxu3 %vm368_vm1, %v2435_v53 }
 0x1f3   :  { %2354 = vmatmul.msk.bf16.gmra.mxu0 %vm368_vm1, %v2436_v54 }
 0x1f4   :  { %2362 = vmatmul.msk.bf16.gmra.mxu1 %vm368_vm1, %v2436_v54 }
 0x201   :  { %2370 = vmatmul.msk.bf16.gmra.mxu2 %vm368_vm1, %v2436_v54 }
 0x202   :  { %2378 = vmatmul.msk.bf16.gmra.mxu3 %vm368_vm1, %v2436_v54 }
 0x203   :  { %2355 = vmatmul.msk.bf16.gmra.mxu0 %vm368_vm1, %v2437_v57 }
 0x204   :  { %2363 = vmatmul.msk.bf16.gmra.mxu1 %vm368_vm1, %v2437_v57 }
 0x211   :  { %2371 = vmatmul.msk.bf16.gmra.mxu2 %vm368_vm1, %v2437_v57 }
 0x212   :  { %2379 = vmatmul.msk.bf16.gmra.mxu3 %vm368_vm1, %v2437_v57 }
 0x213   :  { %2356 = vmatmul.msk.bf16.gmra.mxu0 %vm368_vm1, %v2438_v58 }
 0x214   :  { %2364 = vmatmul.msk.bf16.gmra.mxu1 %vm368_vm1, %v2438_v58 }
 0x221   :  { %2372 = vmatmul.msk.bf16.gmra.mxu2 %vm368_vm1, %v2438_v58 }
 0x222   :  { %2380 = vmatmul.msk.bf16.gmra.mxu3 %vm368_vm1, %v2438_v58 }
 0x223   :  { %2357 = vmatmul.msk.bf16.gmra.mxu0 %vm368_vm1, %v2439_v60 }
 0x224   :  { %2365 = vmatmul.msk.bf16.gmra.mxu1 %vm368_vm1, %v2439_v60 }
 0x231   :  { %2373 = vmatmul.msk.bf16.gmra.mxu2 %vm368_vm1, %v2439_v60 }
 0x232   :  { %2381 = vmatmul.msk.bf16.gmra.mxu3 %vm368_vm1, %v2439_v60 }
 0x233   :  { %2358 = vmatmul.msk.bf16.gmra.mxu0 %vm368_vm1, %v2440_v61 }
 0x234   :  { %2366 = vmatmul.msk.bf16.gmra.mxu1 %vm368_vm1, %v2440_v61 }
 0x241   :  { %2374 = vmatmul.msk.bf16.gmra.mxu2 %vm368_vm1, %v2440_v61 }
 0x242   :  { %2382 = vmatmul.msk.bf16.gmra.mxu3 %vm368_vm1, %v2440_v61 }
 0x243   :  { %2359 = vmatmul.msk.bf16.gmra.mxu0 %vm368_vm1, %v2441_v62 }
 0x244   :  { %2367 = vmatmul.msk.bf16.gmra.mxu1 %vm368_vm1, %v2441_v62 }
 0x250   :  { %v895_v0 = vpop.f32.mrf.mxu0 }
 0x251   :  { %2375 = vmatmul.msk.bf16.gmra.mxu2 %vm368_vm1, %v2441_v62  ;;  %v944_v1 = vpop.f32.mrf.mxu1 }
 0x252   :  { %2383 = vmatmul.msk.bf16.gmra.mxu3 %vm368_vm1, %v2441_v62 }
 0x258   :  { %v897_v2 = vpop.f32.mrf.mxu0 }
 0x259   :  { %v1082_v4 = vadd.f32 %v897_v2, %v895_v0  ;;  %v946_v5 = vpop.f32.mrf.mxu1 }
 0x25a   :  { %v1091_v6 = vadd.f32 %v946_v5, %v944_v1 }
 0x260   :  { %v900_v10 = vpop.f32.mrf.mxu0 }
 0x261   :  { %v1083_v13 = vadd.f32 %v1082_v4, %v900_v10  ;;  %v949_v14 = vpop.f32.mrf.mxu1 }
 0x262   :  { %v1092_v19 = vadd.f32 %v1091_v6, %v949_v14 }
 0x264   :  { %v2941_v20 = vpop.f32.mrf.mxu2 }
 0x265   :  { %v2943_v21 = vpop.f32.mrf.mxu3 }
 0x268   :  { %v902_v23 = vpop.f32.mrf.mxu0 }
 0x269   :  { %v1084_v25 = vadd.f32 %v1083_v13, %v902_v23  ;;  %v951_v26 = vpop.f32.mrf.mxu1 }
 0x26a   :  { %v1093_v15 = vadd.f32 %v1092_v19, %v951_v26 }
 0x26b   :  { %v1085_v17 = vrot.slane %v1084_v25, 4 }
 0x26c   :  { %v2945_v16 = vpop.f32.mrf.mxu2  ;;  %v1094_v7 = vrot.slane %v1093_v15, 4 }
 0x26d   :  { %v1100_v8 = vadd.f32 %v2945_v16, %v2941_v20  ;;  %v2949_v11 = vpop.f32.mrf.mxu3  ;;  %v1086_v63 = vadd.f32 %v1085_v17, %v1084_v25 }
 0x26e   :  { %v1109_v3 = vadd.f32 %v2949_v11, %v2943_v21  ;;  %v1095_v29 = vadd.f32 %v1094_v7, %v1093_v15 }
 0x26f   :  { %v1087_v30 = vrot.slane %v1086_v63, 2 }
 0x270   :  { %v1096_v56 = vrot.slane %v1095_v29, 2  ;;  %v2953_v59 = vpop.f32.mrf.mxu0 }
 0x271   :  { %v1088_v47 = vadd.f32 %v1087_v30, %v1086_v63  ;;  %v2955_v48 = vpop.f32.mrf.mxu1 }
 0x272   :  { %v1097_v51 = vadd.f32 %v1096_v56, %v1095_v29 }
 0x273   :  { %v1089_v39 = vrot.slane %v1088_v47, 1 }
 0x274   :  { %v2957_v43 = vpop.f32.mrf.mxu2  ;;  %v1098_v44 = vrot.slane %v1097_v51, 1 }
 0x275   :  { %v1101_v49 = vadd.f32 %v1100_v8, %v2957_v43  ;;  %v2962_v31 = vpop.f32.mrf.mxu3  ;;  %v1090_v35 = vadd.f32 %v1089_v39, %v1088_v47 }
 0x276   :  { %v1110_v32 = vadd.f32 %v1109_v3, %v2962_v31  ;;  %v1099_v36 = vadd.f32 %v1098_v44, %v1097_v51 }
 0x277   :  { %v1125_v50 = vmul.f32 %v2959_v40, %v1090_v35 }
 0x278   :  { %v1126_v52 = vmul.f32 %v2959_v40, %v1099_v36  ;;  %v2967_v41 = vpop.f32.mrf.mxu0 }
 0x279   :  { %v2969_v27 = vsub.f32 %v895_v0, %v1125_v50  ;;  %v2971_v42 = vsub.f32 %v897_v2, %v1125_v50  ;;  %v2973_v28 = vsub.f32 %v900_v10, %v1125_v50  ;;  %v2975_v45 = vsub.f32 %v902_v23, %v1125_v50  ;;  %v2977_v33 = vpop.f32.mrf.mxu1 }
 0x27a   :  { %v2979_v37 = vsub.f32 %v944_v1, %v1126_v52  ;;  %v2981_v34 = vsub.f32 %v946_v5, %v1126_v52  ;;  %v2983_v38 = vsub.f32 %v949_v14, %v1126_v52  ;;  %v2985_v46 = vsub.f32 %v951_v26, %v1126_v52 }
 0x27b   :  { %3864 = vst [vmem:[#allocation8_spill] sm:$0xff] %v2969_v27  ;;  %v1145_v53 = vmul.f32 %v2969_v27, %v2969_v27  ;;  %v1149_v54 = vmul.f32 %v2971_v42, %v2971_v42  ;;  %v1153_v58 = vmul.f32 %v2973_v28, %v2973_v28  ;;  %v1269_v1 = vadd.f32 %v2967_v41, %v2953_v59 }
 0x27c   :  { %3865 = vst [vmem:[#allocation9_spill] sm:$0xff] %v2971_v42  ;;  %v1000_v57 = vpop.f32.mrf.mxu2  ;;  %v1146_v60 = vmul.f32 %v2979_v37, %v2979_v37  ;;  %v1150_v61 = vmul.f32 %v2981_v34, %v2981_v34  ;;  %v1278_v2 = vadd.f32 %v2977_v33, %v2955_v48  ;;  %v1154_v5 = vmul.f32 %v2983_v38, %v2983_v38 }
 0x27d   :  { %3866 = vst [vmem:[#allocation10_spill] sm:$0xff] %v2973_v28  ;;  %v2997_v62 = vpop.f32.mrf.mxu3  ;;  %v1161_v0 = vadd.f32 %v1149_v54, %v1145_v53  ;;  %v1102_v4 = vadd.f32 %v1101_v49, %v1000_v57  ;;  %v1157_v10 = vmul.f32 %v2975_v45, %v2975_v45  ;;  %v1158_v14 = vmul.f32 %v2985_v46, %v2985_v46 }
 0x27e   :  { %3867 = vst [vmem:[#allocation11_spill] sm:$0xff] %v2979_v37  ;;  %v1170_v6 = vadd.f32 %v1150_v61, %v1146_v60  ;;  %v1111_v9 = vadd.f32 %v1110_v32, %v2997_v62 }
 0x27f   :  { %3868 = vst [vmem:[#allocation12_spill] sm:$0xff] %v2981_v34  ;;  %v1162_v12 = vadd.f32 %v1161_v0, %v1153_v58  ;;  %v1103_v13 = vrot.slane %v1102_v4, 4 }
 0x280   :  { %3869 = vst [vmem:[#allocation13_spill] sm:$0xff] %v2983_v38  ;;  %v1171_v19 = vadd.f32 %v1170_v6, %v1154_v5  ;;  %v1112_v22 = vrot.slane %v1111_v9, 4  ;;  %v3010_v23 = vpop.f32.mrf.mxu0 }
 0x281   :  { %v1163_v24 = vadd.f32 %v1162_v12, %v1157_v10  ;;  %v1104_v25 = vadd.f32 %v1103_v13, %v1102_v4  ;;  %v1270_v26 = vadd.f32 %v1269_v1, %v3010_v23  ;;  %v3013_v15 = vpop.f32.mrf.mxu1 }
 0x282   :  { %v1172_v17 = vadd.f32 %v1171_v19, %v1158_v14  ;;  %v1113_v18 = vadd.f32 %v1112_v22, %v1111_v9  ;;  %v1279_v7 = vadd.f32 %v1278_v2, %v3013_v15 }
 0x283   :  { %v1164_v8 = vrot.slane %v1163_v24, 4  ;;  %v1105_v63 = vrot.slane %v1104_v25, 2 }
 0x284   :  { %v3016_v3 = vpop.f32.mrf.mxu2  ;;  %v1173_v29 = vrot.slane %v1172_v17, 4  ;;  %v1114_v30 = vrot.slane %v1113_v18, 2 }
 0x285   :  { %v3018_v55 = vpop.f32.mrf.mxu3  ;;  %v1165_v56 = vadd.f32 %v1164_v8, %v1163_v24  ;;  %v1106_v47 = vadd.f32 %v1105_v63, %v1104_v25 }
 0x286   :  { %v1174_v51 = vadd.f32 %v1173_v29, %v1172_v17  ;;  %v1115_v39 = vadd.f32 %v1114_v30, %v1113_v18 }
 0x287   :  { %v1166_v44 = vrot.slane %v1165_v56, 2  ;;  %v1107_v49 = vrot.slane %v1106_v47, 1 }
 0x288   :  { %v1175_v35 = vrot.slane %v1174_v51, 2  ;;  %v1116_v32 = vrot.slane %v1115_v39, 1  ;;  %v3020_v36 = vpop.f32.mrf.mxu0 }
 0x289   :  { %v1167_v50 = vadd.f32 %v1166_v44, %v1165_v56  ;;  %v1108_v52 = vadd.f32 %v1107_v49, %v1106_v47  ;;  %v1271_v53 = vadd.f32 %v1270_v26, %v3020_v36  ;;  %v3023_v54 = vpop.f32.mrf.mxu1 }
 0x28a   :  { %v1176_v58 = vadd.f32 %v1175_v35, %v1174_v51  ;;  %v1117_v60 = vadd.f32 %v1116_v32, %v1115_v39  ;;  %v1280_v61 = vadd.f32 %v1279_v7, %v3023_v54 }
 0x28b   :  { %v1168_v0 = vrot.slane %v1167_v50, 1  ;;  %v1127_v1 = vmul.f32 %v2959_v40, %v1108_v52  ;;  %v1272_v6 = vrot.slane %v1271_v53, 4 }
 0x28c   :  { %v3027_v2 = vpop.f32.mrf.mxu2  ;;  %v1177_v4 = vrot.slane %v1176_v58, 1  ;;  %v1128_v5 = vmul.f32 %v2959_v40, %v1117_v60  ;;  %v1281_v18 = vrot.slane %v1280_v61, 4 }
 0x28d   :  { %v1287_v9 = vadd.f32 %v3027_v2, %v3016_v3  ;;  %v3032_v10 = vpop.f32.mrf.mxu3  ;;  %v1169_v12 = vadd.f32 %v1168_v0, %v1167_v50  ;;  %v3035_v13 = vsub.f32 %v2941_v20, %v1127_v1  ;;  %v3038_v14 = vsub.f32 %v2945_v16, %v1127_v1 }
 0x28e   :  { %v3041_v19 = vsub.f32 %v2957_v43, %v1127_v1  ;;  %v1178_v22 = vadd.f32 %v1177_v4, %v1176_v58  ;;  %v3043_v24 = vsub.f32 %v1000_v57, %v1127_v1  ;;  %v3046_v25 = vsub.f32 %v2943_v21, %v1128_v5 }
 0x28f   :  { %3870 = vst [vmem:[#allocation14_spill] sm:$0xff] %v3035_v13  ;;  %v3049_v26 = vsub.f32 %v2949_v11, %v1128_v5  ;;  %v1197_v17 = vmul.f32 %v1169_v12, %v2959_v40  ;;  %v1147_v20 = vmul.f32 %v3035_v13, %v3035_v13  ;;  %v1151_v16 = vmul.f32 %v3038_v14, %v3038_v14 }
 0x290   :  { %3871 = vst [vmem:[#allocation15_spill] sm:$0xff] %v3038_v14  ;;  %v1198_v43 = vmul.f32 %v1178_v22, %v2959_v40  ;;  %v1155_v57 = vmul.f32 %v3041_v19, %v3041_v19  ;;  %v3060_v21 = vsub.f32 %v2962_v31, %v1128_v5  ;;  %v3063_v11 = vsub.f32 %v2997_v62, %v1128_v5  ;;  %v3065_v7 = vpop.f32.mrf.mxu0 }
 0x291   :  { %3872 = vst [vmem:[#allocation16_spill] sm:$0xff] %v3041_v19  ;;  %v3067_v8 = vadd.f32 1e-05, %v1197_v17  ;;  %v1179_v63 = vadd.f32 %v1151_v16, %v1147_v20  ;;  %v1148_v29 = vmul.f32 %v3046_v25, %v3046_v25  ;;  %v1152_v30 = vmul.f32 %v3049_v26, %v3049_v26  ;;  %v3073_v56 = vpop.f32.mrf.mxu1 }
 0x292   :  { %3873 = vst [vmem:[#allocation17_spill] sm:$0xff] %v3046_v25  ;;  %v3075_v47 = vadd.f32 1e-05, %v1198_v43  ;;  %v1159_v31 = vmul.f32 %v3043_v24, %v3043_v24  ;;  %v1273_v62 = vadd.f32 %v1272_v6, %v1271_v53  ;;  %v1156_v39 = vmul.f32 %v3060_v21, %v3060_v21 }
 0x293   :  { %3874 = vst [vmem:[#allocation18_spill] sm:$0xff] %v3049_v26  ;;  %2457 = vrsqrt.f32 %v3067_v8  ;;  %v1180_v51 = vadd.f32 %v1179_v63, %v1155_v57  ;;  %v1188_v44 = vadd.f32 %v1152_v30, %v1148_v29  ;;  %v1160_v35 = vmul.f32 %v3063_v11, %v3063_v11 }
 0x294   :  { %3875 = vst [vmem:[#allocation19_spill] sm:$0xff] %v3060_v21  ;;  %v3082_v49 = vpop.f32.mrf.mxu2  ;;  %2459 = vrsqrt.f32 %v3075_v47  ;;  %v1274_v32 = vrot.slane %v1273_v62, 2  ;;  %v1282_v50 = vadd.f32 %v1281_v18, %v1280_v61  ;;  %v1296_v60 = vadd.f32 %v3032_v10, %v3018_v55 }
 0x295   :  { %v3087_v52 = vpop.f32.mrf.mxu3  ;;  %v1181_v58 = vadd.f32 %v1180_v51, %v1159_v31  ;;  %v1189_v53 = vadd.f32 %v1188_v44, %v1156_v39  ;;  %v1288_v0 = vadd.f32 %v1287_v9, %v3082_v49  ;;  %vm1211_vm5 = vweird.f32 %v3067_v8 }
 0x296   :  { %v1275_v1 = vadd.f32 %v1274_v32, %v1273_v62  ;;  %v1283_v4 = vrot.slane %v1282_v50, 2  ;;  %v1297_v12 = vadd.f32 %v1296_v60, %v3087_v52  ;;  %vm1221_vm7 = vweird.f32 %v3075_v47 }
 0x297   :  { %v1182_v5 = vrot.slane %v1181_v58, 4  ;;  %v1190_v6 = vadd.f32 %v1189_v53, %v1160_v35 }
 0x298   :  { %v1276_v22 = vrot.slane %v1275_v1, 1  ;;  %v1284_v17 = vadd.f32 %v1283_v4, %v1282_v50  ;;  %v3093_v20 = vpop.f32.mrf.mxu0 }
 0x299   :  { %v2458_v61 = vpop.eup %2457  ;;  %v1183_v16 = vadd.f32 %v1182_v5, %v1181_v58  ;;  %v1191_v18 = vrot.slane %v1190_v6, 4  ;;  %v3095_v43 = vpop.f32.mrf.mxu1  ;;  %v3101_v30 = vadd.f32 %v3093_v20, %v3065_v7 }
 0x29a   :  { %v2460_v57 = vpop.eup %2459  ;;  %v1206_v63 = vmul.f32 %v2458_v61, %v3067_v8  ;;  %v1277_v9 = vadd.f32 %v1276_v22, %v1275_v1  ;;  %v1285_v29 = vrot.slane %v1284_v17, 1  ;;  %vm1212_vm6 = vweird.f32 %v2458_v61 }
 0x29b   :  { %v1216_v31 = vmul.f32 %v2460_v57, %v3075_v47  ;;  %v1184_v62 = vrot.slane %v1183_v16, 2  ;;  %v1192_v51 = vadd.f32 %v1191_v18, %v1190_v6  ;;  %vm1222_vm8 = vweird.f32 %v2460_v57  ;;  %vm1213_vm9 = vmor %vm1211_vm5, %vm1212_vm6 }
 0x29c   :  { %v3105_v39 = vpop.f32.mrf.mxu2  ;;  %v1207_v44 = vmul.f32 %v2458_v61, %v1206_v63  ;;  %v1305_v35 = vmul.f32 %v1277_v9, %v2959_v40  ;;  %v1286_v32 = vadd.f32 %v1285_v29, %v1284_v17  ;;  %vm1223_vm10 = vmor %vm1221_vm7, %vm1222_vm8 }
 0x29d   :  { %v3108_v50 = vpop.f32.mrf.mxu3  ;;  %v1217_v58 = vmul.f32 %v2460_v57, %v1216_v31  ;;  %v1185_v53 = vadd.f32 %v1184_v62, %v1183_v16  ;;  %v1193_v60 = vrot.slane %v1192_v51, 2  ;;  %v1289_v1 = vadd.f32 %v1288_v0, %v3105_v39 }
 0x29e   :  { %v1208_v4 = vmul.f32 0.5, %v1207_v44  ;;  %v3112_v5 = vsub.f32 %v2953_v59, %v1305_v35  ;;  %v3115_v6 = vsub.f32 %v2967_v41, %v1305_v35  ;;  %v3118_v22 = vsub.f32 %v3010_v23, %v1305_v35 }
 0x29f   :  { %v1218_v18 = vmul.f32 0.5, %v1217_v58  ;;  %v1186_v63 = vrot.slane %v1185_v53, 1  ;;  %v1194_v17 = vadd.f32 %v1193_v60, %v1192_v51  ;;  %v3121_v9 = vsub.f32 %v3020_v36, %v1305_v35 }
 0x2a0   :  { %3876 = vst [vmem:[#allocation20_spill] sm:$0xff] %v3115_v6  ;;  %v1209_v16 = vsub.f32 1.5, %v1208_v4  ;;  %v1325_v0 = vmul.f32 %v3112_v5, %v3112_v5  ;;  %v1329_v59 = vmul.f32 %v3115_v6, %v3115_v6  ;;  %v1333_v41 = vmul.f32 %v3118_v22, %v3118_v22  ;;  %v3129_v29 = vpop.f32.mrf.mxu0 }
 0x2a1   :  { %v1219_v23 = vsub.f32 1.5, %v1218_v18  ;;  %v1187_v31 = vadd.f32 %v1186_v63, %v1185_v53  ;;  %v1195_v62 = vrot.slane %v1194_v17, 1  ;;  %v1337_v51 = vmul.f32 %v3121_v9, %v3121_v9  ;;  %v3133_v36 = vpop.f32.mrf.mxu1 }
 0x2a2   :  { %v1210_v44 = vmul.f32 %v2458_v61, %v1209_v16  ;;  %v1341_v35 = vadd.f32 %v1329_v59, %v1325_v0  ;;  %v1306_v58 = vmul.f32 %v1286_v32, %v2959_v40  ;;  %v1290_v60 = vrot.slane %v1289_v1, 4 }
 0x2a3   :  { %v1220_v4 = vmul.f32 %v2460_v57, %v1219_v23  ;;  %v1199_v26 = vmul.f32 %v1187_v31, %v2959_v40  ;;  %v1196_v18 = vadd.f32 %v1195_v62, %v1194_v17  ;;  %v1298_v53 = vadd.f32 %v1297_v12, %v3108_v50 }
 0x2a4   :  { %v3141_v63 = vpop.f32.mrf.mxu2  ;;  %v3143_v14 = vsel %vm1213_vm9, %v2458_v61, %v1210_v44  ;;  %v1342_v32 = vadd.f32 %v1341_v35, %v1333_v41  ;;  %v3149_v16 = vsub.f32 %v2955_v48, %v1306_v58  ;;  %v3152_v8 = vsub.f32 %v2977_v33, %v1306_v58 }
 0x2a5   :  { %3877 = vst [vmem:[#allocation21_spill] sm:$0xff] %v3143_v14  ;;  %v3154_v0 = vpop.f32.mrf.mxu3  ;;  %v1257_v12 = vmul.f32 %v3143_v14, %v2975_v45  ;;  %v3158_v17 = vsel %vm1223_vm10, %v2460_v57, %v1220_v4  ;;  %v3160_v61 = vadd.f32 1e-05, %v1199_v26  ;;  %v1200_v59 = vmul.f32 %v1196_v18, %v2959_v40 }
 0x2a6   :  { %3878 = vst [vmem:[#allocation22_spill] sm:$0xff] %v3149_v16  ;;  %v1258_v47 = vmul.f32 %v3158_v17, %v2985_v46  ;;  %v1343_v41 = vadd.f32 %v1342_v32, %v1337_v51  ;;  %v3166_v48 = vsub.f32 %v3013_v15, %v1306_v58  ;;  %v3169_v33 = vsub.f32 %v3023_v54, %v1306_v58 }
 0x2a7   :  { %3879 = vst [vmem:[#allocation23_spill] sm:$0xff] %v3152_v8  ;;  %2461 = vrsqrt.f32 %v3160_v61  ;;  %v3172_v23 = vadd.f32 1e-05, %v1200_v59  ;;  %v1326_v45 = vmul.f32 %v3149_v16, %v3149_v16  ;;  %v1458_v26 = vadd.f32 %v3095_v43, %v3073_v56 }
 0x2a8   :  { %3880 = vst [vmem:[#allocation24_spill] sm:$0xff] %v3158_v17  ;;  %v3178_v57 = vpack.c.bf16 %v1258_v47, %v1257_v12  ;;  %v1344_v46 = vrot.slane %v1343_v41, 4  ;;  %v1330_v15 = vmul.f32 %v3152_v8, %v3152_v8  ;;  %v3182_v31 = vpop.f32.mrf.mxu0  ;;  %v1334_v54 = vmul.f32 %v3166_v48, %v3166_v48 }
 0x2a9   :  { %2463 = vrsqrt.f32 %v3172_v23  ;;  %v1291_v62 = vadd.f32 %v1290_v60, %v1289_v1  ;;  %v1299_v35 = vrot.slane %v1298_v53, 4  ;;  %v1450_v58 = vadd.f32 %v3101_v30, %v3129_v29  ;;  %v3189_v4 = vpop.f32.mrf.mxu1 }
 0x2aa   :  { %3881 = vst [vmem:[#allocation25_spill] sm:$0xff] %v3178_v57  ;;  %v1345_v51 = vadd.f32 %v1344_v46, %v1343_v41  ;;  %v1350_v44 = vadd.f32 %v1330_v15, %v1326_v45  ;;  %v1338_v18 = vmul.f32 %v3169_v33, %v3169_v33  ;;  %v1459_v12 = vadd.f32 %v1458_v26, %v3133_v36 }
 0x2ab   :  { %v1292_v32 = vrot.slane %v1291_v62, 2  ;;  %v1300_v25 = vadd.f32 %v1299_v35, %v1298_v53  ;;  %v1451_v13 = vadd.f32 %v1450_v58, %v3182_v31  ;;  %vm1231_vm11 = vweird.f32 %v3160_v61 }
 0x2ac   :  { %v1346_v59 = vrot.slane %v1345_v51, 2  ;;  %v1351_v47 = vadd.f32 %v1350_v44, %v1334_v54  ;;  %v3195_v1 = vpop.f32.mrf.mxu2  ;;  %v1460_v45 = vadd.f32 %v1459_v12, %v3189_v4  ;;  %vm1241_vm15 = vweird.f32 %v3172_v23 }
 0x2ad   :  { %v2462_v60 = vpop.eup %2461  ;;  %v1293_v41 = vadd.f32 %v1292_v32, %v1291_v62  ;;  %v3200_v21 = vpop.f32.mrf.mxu3  ;;  %v1301_v53 = vrot.slane %v1300_v25, 2  ;;  %v1452_v44 = vrot.slane %v1451_v13, 4 }
 0x2ae   :  { %v1226_v30 = vmul.f32 %v2462_v60, %v3160_v61  ;;  %vm1232_vm12 = vweird.f32 %v2462_v60  ;;  %v1347_v46 = vadd.f32 %v1346_v59, %v1345_v51  ;;  %v1352_v15 = vadd.f32 %v1351_v47, %v1338_v18 }
 0x2af   :  { %v2464_v26 = vpop.eup %2463  ;;  %v1294_v54 = vrot.slane %v1293_v41, 1  ;;  %v1461_v35 = vrot.slane %v1460_v45, 4  ;;  %v1302_v42 = vadd.f32 %v1301_v53, %v1300_v25  ;;  %v1453_v37 = vadd.f32 %v1452_v44, %v1451_v13  ;;  %vm1233_vm14 = vmor %vm1231_vm11, %vm1232_vm12 }
 0x2b0   :  { %v1227_v58 = vmul.f32 %v2462_v60, %v1226_v30  ;;  %v1236_v19 = vmul.f32 %v2464_v26, %v3172_v23  ;;  %vm1242_vm13 = vweird.f32 %v2464_v26  ;;  %v1348_v62 = vrot.slane %v1347_v46, 1  ;;  %v3203_v32 = vpop.f32.mrf.mxu0 }
 0x2b1   :  { %v1353_v12 = vrot.slane %v1352_v15, 4  ;;  %v1295_v34 = vadd.f32 %v1294_v54, %v1293_v41  ;;  %v1462_v47 = vadd.f32 %v1461_v35, %v1460_v45  ;;  %v1303_v17 = vrot.slane %v1302_v42, 1  ;;  %vm1243_vm0 = vmor %vm1241_vm15, %vm1242_vm13 }
 0x2b2   :  { %v1228_v51 = vmul.f32 0.5, %v1227_v58  ;;  %v1237_v18 = vmul.f32 %v2464_v26, %v1236_v19  ;;  %v1349_v59 = vadd.f32 %v1348_v62, %v1347_v46  ;;  %v1454_v38 = vrot.slane %v1453_v37, 2 }
 0x2b3   :  { %v1354_v27 = vadd.f32 %v1353_v12, %v1352_v15  ;;  %v1307_v57 = vmul.f32 %v1295_v34, %v2959_v40  ;;  %v1463_v8 = vrot.slane %v1462_v47, 2  ;;  %v3230_v15 = vpop.f32.mrf.mxu1 }
 0x2b4   :  { %v1229_v30 = vsub.f32 1.5, %v1228_v51  ;;  %v1238_v14 = vmul.f32 0.5, %v1237_v18  ;;  %v1377_v28 = vmul.f32 %v1349_v59, %v2959_v40  ;;  %v3221_v46 = vpop.f32.mrf.mxu2  ;;  %v1455_v53 = vadd.f32 %v1454_v38, %v1453_v37 }
 0x2b5   :  { %v1355_v6 = vrot.slane %v1354_v27, 2  ;;  %v3208_v16 = vsub.f32 %v3016_v3, %v1307_v57  ;;  %v3211_v13 = vsub.f32 %v3027_v2, %v1307_v57  ;;  %v3214_v19 = vsub.f32 %v3082_v49, %v1307_v57 }
 0x2b6   :  { %v1230_v25 = vmul.f32 %v2462_v60, %v1229_v30  ;;  %v1239_v41 = vsub.f32 1.5, %v1238_v14  ;;  %v3216_v34 = vadd.f32 1e-05, %v1377_v28  ;;  %v3219_v45 = vsub.f32 %v3105_v39, %v1307_v57  ;;  %v3236_v39 = vpop.f32.mrf.mxu3 }
 0x2b7   :  { %3882 = vst [vmem:[#allocation26_spill] sm:$0xff] %v3208_v16  ;;  %v1356_v3 = vadd.f32 %v1355_v6, %v1354_v27  ;;  %v1327_v2 = vmul.f32 %v3208_v16, %v3208_v16  ;;  %v1331_v49 = vmul.f32 %v3211_v13, %v3211_v13  ;;  %v1335_v61 = vmul.f32 %v3214_v19, %v3214_v19 }
 0x2b8   :  { %3883 = vst [vmem:[#allocation27_spill] sm:$0xff] %v3211_v13  ;;  %v3232_v28 = vsel %vm1233_vm14, %v2462_v60, %v1230_v25  ;;  %v1240_v14 = vmul.f32 %v2464_v26, %v1239_v41  ;;  %2465 = vrsqrt.f32 %v3216_v34  ;;  %v1304_v60 = vadd.f32 %v1303_v17, %v1302_v42  ;;  %v3245_v23 = vpop.f32.mrf.mxu0 }
 0x2b9   :  { %3884 = vst [vmem:[#allocation28_spill] sm:$0xff] %v3214_v19  ;;  %v1259_v27 = vmul.f32 %v3232_v28, %v3043_v24  ;;  %v1357_v6 = vrot.slane %v1356_v3, 1  ;;  %v1359_v57 = vadd.f32 %v1331_v49, %v1327_v2  ;;  %v1464_v44 = vadd.f32 %v1463_v8, %v1462_v47 }
 0x2ba   :  { %3885 = vst [vmem:[#allocation29_spill] sm:$0xff] %v3232_v28  ;;  %v3243_v54 = vsel %vm1243_vm0, %v2464_v26, %v1240_v14  ;;  %v1339_v24 = vmul.f32 %v3219_v45, %v3219_v45  ;;  %v1308_v12 = vmul.f32 %v1304_v60, %v2959_v40  ;;  %v1456_v51 = vrot.slane %v1455_v53, 1 }
 0x2bb   :  { %3886 = vst [vmem:[#allocation30_spill] sm:$0xff] %v3243_v54  ;;  %v1260_v35 = vmul.f32 %v3243_v54, %v3063_v11  ;;  %v1358_v58 = vadd.f32 %v1357_v6, %v1356_v3  ;;  %v1360_v62 = vadd.f32 %v1359_v57, %v1335_v61  ;;  %v1467_v26 = vadd.f32 %v3195_v1, %v3141_v63  ;;  %v3286_v6 = vpop.f32.mrf.mxu1 }
 0x2bc   :  { %v1476_v42 = vadd.f32 %v3200_v21, %v3154_v0  ;;  %v1465_v11 = vrot.slane %v1464_v44, 1  ;;  %v3260_v18 = vsub.f32 %v3018_v55, %v1308_v12  ;;  %v3263_v59 = vsub.f32 %v3032_v10, %v1308_v12  ;;  %v3283_v49 = vpop.f32.mrf.mxu2 }
 0x2bd   :  { %v3256_v37 = vpack.c.bf16 %v1260_v35, %v1259_v27  ;;  %v1378_v38 = vmul.f32 %v1358_v58, %v2959_v40  ;;  %v1361_v8 = vadd.f32 %v1360_v62, %v1339_v24  ;;  %v3266_v47 = vsub.f32 %v3087_v52, %v1308_v12 }
 0x2be   :  { %v2466_v17 = vpop.eup %2465  ;;  %3888 = vst [vmem:[#allocation32_spill] sm:$0xff] %v3260_v18  ;;  %v3269_v30 = vsub.f32 %v3108_v50, %v1308_v12  ;;  %vm1391_vm1 = vweird.f32 %v3216_v34  ;;  %v1468_v2 = vadd.f32 %v1467_v26, %v3221_v46  ;;  %v1328_v55 = vmul.f32 %v3260_v18, %v3260_v18  ;;  %v3290_v58 = vpop.f32.mrf.mxu3 }
 0x2bf   :  { %3887 = vst [vmem:[#allocation31_spill] sm:$0xff] %v3256_v37  ;;  %v1386_v25 = vmul.f32 %v2466_v17, %v3216_v34  ;;  %v3273_v41 = vadd.f32 1e-05, %v1378_v38  ;;  %v1362_v3 = vrot.slane %v1361_v8, 4  ;;  %v1332_v10 = vmul.f32 %v3263_v59, %v3263_v59 }
 0x2c0   :  { %3889 = vst [vmem:[#allocation33_spill] sm:$0xff] %v3263_v59  ;;  %v1477_v52 = vadd.f32 %v1476_v42, %v3236_v39  ;;  %v1629_v50 = vadd.f32 %v3245_v23, %v3203_v32  ;;  %vm1392_vm2 = vweird.f32 %v2466_v17  ;;  %v1336_v61 = vmul.f32 %v3266_v47, %v3266_v47 }
 0x2c1   :  { %3890 = vst [vmem:[#allocation34_spill] sm:$0xff] %v3266_v47  ;;  %v1387_v14 = vmul.f32 %v2466_v17, %v1386_v25  ;;  %2467 = vrsqrt.f32 %v3273_v41  ;;  %v1363_v27 = vadd.f32 %v1362_v3, %v1361_v8  ;;  %v1368_v57 = vadd.f32 %v1332_v10, %v1328_v55  ;;  %vm1393_vm3 = vmor %vm1391_vm1, %vm1392_vm2 }
 0x2c2   :  { %v1457_v60 = vadd.f32 %v1456_v51, %v1455_v53  ;;  %v1466_v35 = vadd.f32 %v1465_v11, %v1464_v44  ;;  %v1340_v12 = vmul.f32 %v3269_v30, %v3269_v30  ;;  %v1469_v26 = vadd.f32 %v1468_v2, %v3283_v49  ;;  %v3301_v53 = vpop.f32.mrf.mxu0 }
 0x2c3   :  { %v1388_v24 = vmul.f32 0.5, %v1387_v14  ;;  %v1364_v62 = vrot.slane %v1363_v27, 2  ;;  %v1369_v42 = vadd.f32 %v1368_v57, %v1336_v61  ;;  %v3299_v25 = vadd.f32 %v3286_v6, %v3230_v15 }
 0x2c4   :  { %v1485_v38 = vmul.f32 %v1457_v60, %v2959_v40  ;;  %v1486_v8 = vmul.f32 %v1466_v35, %v2959_v40  ;;  %v1478_v11 = vadd.f32 %v1477_v52, %v3290_v58  ;;  %v1630_v3 = vadd.f32 %v1629_v50, %v3301_v53 }
 0x2c5   :  { %v1389_v44 = vsub.f32 1.5, %v1388_v24  ;;  %v1365_v51 = vadd.f32 %v1364_v62, %v1363_v27  ;;  %v1370_v55 = vadd.f32 %v1369_v42, %v1340_v12  ;;  %v1470_v27 = vrot.slane %v1469_v26, 4 }
 0x2c6   :  { %v3306_v2 = vsub.f32 %v3065_v7, %v1485_v38  ;;  %v3309_v10 = vsub.f32 %v3093_v20, %v1485_v38  ;;  %v3312_v14 = vsub.f32 %v3129_v29, %v1485_v38  ;;  %v3315_v35 = vsub.f32 %v3182_v31, %v1485_v38  ;;  %v3362_v13 = vpop.f32.mrf.mxu3 }
 0x2c7   :  { %v2468_v61 = vpop.eup %2467  ;;  %v1390_v57 = vmul.f32 %v2466_v17, %v1389_v44  ;;  %v1366_v60 = vrot.slane %v1365_v51, 1  ;;  %vm1401_vm4 = vweird.f32 %v3273_v41  ;;  %v1371_v20 = vrot.slane %v1370_v55, 4 }
 0x2c8   :  { %v1396_v7 = vmul.f32 %v2468_v61, %v3273_v41  ;;  %v1505_v29 = vmul.f32 %v3306_v2, %v3306_v2  ;;  %v3325_v52 = vsub.f32 %v3073_v56, %v1486_v8  ;;  %v1509_v24 = vmul.f32 %v3309_v10, %v3309_v10 }
 0x2c9   :  { %v3327_v50 = vsel %vm1393_vm3, %v2466_v17, %v1390_v57  ;;  %v1367_v31 = vadd.f32 %v1366_v60, %v1365_v51  ;;  %v1479_v62 = vrot.slane %v1478_v11, 4  ;;  %v1372_v42 = vadd.f32 %v1371_v20, %v1370_v55  ;;  %v3342_v51 = vpop.f32.mrf.mxu1 }
 0x2ca   :  { %v1437_v34 = vmul.f32 %v3327_v50, %v3121_v9  ;;  %v1397_v12 = vmul.f32 %v2468_v61, %v1396_v7  ;;  %v1513_v38 = vmul.f32 %v3312_v14, %v3312_v14  ;;  %v1521_v54 = vadd.f32 %v1509_v24, %v1505_v29  ;;  %v3357_v37 = vpop.f32.mrf.mxu0 }
 0x2cb   :  { %v1379_v44 = vmul.f32 %v1367_v31, %v2959_v40  ;;  %v3337_v56 = vsub.f32 %v3095_v43, %v1486_v8  ;;  %v3340_v17 = vsub.f32 %v3133_v36, %v1486_v8  ;;  %v1373_v60 = vrot.slane %v1372_v42, 2 }
 0x2cc   :  { %v1398_v57 = vmul.f32 0.5, %v1397_v12  ;;  %v1517_v9 = vmul.f32 %v3315_v35, %v3315_v35  ;;  %v1506_v55 = vmul.f32 %v3325_v52, %v3325_v52  ;;  %v1522_v20 = vadd.f32 %v1521_v54, %v1513_v38  ;;  %v3355_v12 = vpop.f32.mrf.mxu2 }
 0x2cd   :  { %v3348_v7 = vadd.f32 1e-05, %v1379_v44  ;;  %v3351_v29 = vsub.f32 %v3189_v4, %v1486_v8  ;;  %v1510_v43 = vmul.f32 %v3337_v56, %v3337_v56  ;;  %vm1402_vm5 = vweird.f32 %v2468_v61 }
 0x2ce   :  { %v1399_v36 = vsub.f32 1.5, %v1398_v57  ;;  %v1374_v31 = vadd.f32 %v1373_v60, %v1372_v42  ;;  %v1471_v24 = vadd.f32 %v1470_v27, %v1469_v26  ;;  %v1523_v28 = vadd.f32 %v1522_v20, %v1517_v9  ;;  %vm1403_vm6 = vmor %vm1401_vm4, %vm1402_vm5 }
 0x2cf   :  { %2469 = vrsqrt.f32 %v3348_v7  ;;  %v1514_v54 = vmul.f32 %v3340_v17, %v3340_v17  ;;  %v1530_v38 = vadd.f32 %v1510_v43, %v1506_v55  ;;  %v1480_v59 = vadd.f32 %v1479_v62, %v1478_v11 }
 0x2d0   :  { %v1400_v4 = vmul.f32 %v2468_v61, %v1399_v36  ;;  %v1375_v8 = vrot.slane %v1374_v31, 1  ;;  %v1472_v44 = vrot.slane %v1471_v24, 2  ;;  %v1524_v26 = vrot.slane %v1523_v28, 4 }
 0x2d1   :  { %v1518_v27 = vmul.f32 %v3351_v29, %v3351_v29  ;;  %v1531_v42 = vadd.f32 %v1530_v38, %v1514_v54  ;;  %v1631_v57 = vadd.f32 %v1630_v3, %v3357_v37  ;;  %v1481_v20 = vrot.slane %v1480_v59, 2 }
 0x2d2   :  { %v3369_v60 = vsel %vm1403_vm6, %v2468_v61, %v1400_v4  ;;  %v1376_v9 = vadd.f32 %v1375_v8, %v1374_v31  ;;  %v1473_v55 = vadd.f32 %v1472_v44, %v1471_v24  ;;  %v1525_v62 = vadd.f32 %v1524_v26, %v1523_v28  ;;  %v3378_v4 = vpop.f32.mrf.mxu1 }
 0x2d3   :  { %v1438_v11 = vmul.f32 %v3369_v60, %v3169_v33  ;;  %v1532_v43 = vadd.f32 %v1531_v42, %v1518_v27  ;;  %v1632_v36 = vrot.slane %v1631_v57, 4  ;;  %v1482_v16 = vadd.f32 %v1481_v20, %v1480_v59 }
 0x2d4   :  { %v1380_v41 = vmul.f32 %v1376_v9, %v2959_v40  ;;  %v1474_v18 = vrot.slane %v1473_v55, 1  ;;  %v1639_v54 = vadd.f32 %v3299_v25, %v3342_v51  ;;  %v1526_v61 = vrot.slane %v1525_v62, 2  ;;  %v3387_v42 = vpop.f32.mrf.mxu2 }
 0x2d5   :  { %v2470_v38 = vpop.eup %2469  ;;  %v3376_v3 = vpack.c.bf16 %v1438_v11, %v1437_v34  ;;  %v1533_v31 = vrot.slane %v1532_v43, 4  ;;  %v1633_v24 = vadd.f32 %v1632_v36, %v1631_v57  ;;  %vm1411_vm7 = vweird.f32 %v3348_v7 }
 0x2d6   :  { %v1406_v33 = vmul.f32 %v2470_v38, %v3348_v7  ;;  %v3381_v28 = vadd.f32 1e-05, %v1380_v41  ;;  %v1475_v8 = vadd.f32 %v1474_v18, %v1473_v55  ;;  %v1527_v44 = vadd.f32 %v1526_v61, %v1525_v62 }
 0x2d7   :  { %v1534_v59 = vadd.f32 %v1533_v31, %v1532_v43  ;;  %v1483_v26 = vrot.slane %v1482_v16, 1  ;;  %v1640_v34 = vadd.f32 %v1639_v54, %v3378_v4  ;;  %v1634_v11 = vrot.slane %v1633_v24, 2  ;;  %v3398_v43 = vpop.f32.mrf.mxu3 }
 0x2d8   :  { %v1407_v27 = vmul.f32 %v2470_v38, %v1406_v33  ;;  %2471 = vrsqrt.f32 %v3381_v28  ;;  %v1487_v25 = vmul.f32 %v1475_v8, %v2959_v40  ;;  %v1528_v57 = vrot.slane %v1527_v44, 1 }
 0x2d9   :  { %v1535_v9 = vrot.slane %v1534_v59, 2  ;;  %v1484_v20 = vadd.f32 %v1483_v26, %v1482_v16  ;;  %vm1412_vm8 = vweird.f32 %v2470_v38  ;;  %vm1421_vm10 = vweird.f32 %v3381_v28 }
 0x2da   :  { %v1408_v36 = vmul.f32 0.5, %v1407_v27  ;;  %v3390_v18 = vsub.f32 %v3141_v63, %v1487_v25  ;;  %v3393_v55 = vsub.f32 %v3195_v1, %v1487_v25  ;;  %v3396_v62 = vsub.f32 %v3221_v46, %v1487_v25  ;;  %vm1413_vm9 = vmor %vm1411_vm7, %vm1412_vm8 }
 0x2db   :  { %v1529_v41 = vadd.f32 %v1528_v57, %v1527_v44  ;;  %v1536_v54 = vadd.f32 %v1535_v9, %v1534_v59  ;;  %v3401_v61 = vsub.f32 %v3283_v49, %v1487_v25  ;;  %v1488_v16 = vmul.f32 %v1484_v20, %v2959_v40 }
 0x2dc   :  { %3891 = vst [vmem:[#allocation35_spill] sm:$0xff] %v3390_v18  ;;  %v1409_v31 = vsub.f32 1.5, %v1408_v36  ;;  %v1507_v63 = vmul.f32 %v3390_v18, %v3390_v18  ;;  %v1511_v1 = vmul.f32 %v3393_v55, %v3393_v55  ;;  %v1635_v44 = vadd.f32 %v1634_v11, %v1633_v24 }
 0x2dd   :  { %3892 = vst [vmem:[#allocation36_spill] sm:$0xff] %v3393_v55  ;;  %v1557_v46 = vmul.f32 %v1529_v41, %v2959_v40  ;;  %v1537_v33 = vrot.slane %v1536_v54, 1  ;;  %v3410_v8 = vsub.f32 %v3154_v0, %v1488_v16  ;;  %v1515_v26 = vmul.f32 %v3396_v62, %v3396_v62 }
 0x2de   :  { %v2472_v59 = vpop.eup %2471  ;;  %v1410_v49 = vmul.f32 %v2470_v38, %v1409_v31  ;;  %v1539_v27 = vadd.f32 %v1511_v1, %v1507_v63  ;;  %v3415_v25 = vsub.f32 %v3200_v21, %v1488_v16  ;;  %v1519_v0 = vmul.f32 %v3401_v61, %v3401_v61  ;;  %v3441_v63 = vpop.f32.mrf.mxu2 }
 0x2df   :  { %3893 = vst [vmem:[#allocation37_spill] sm:$0xff] %v3410_v8  ;;  %v1416_v57 = vmul.f32 %v2472_v59, %v3381_v28  ;;  %v3420_v9 = vadd.f32 1e-05, %v1557_v46  ;;  %v1538_v20 = vadd.f32 %v1537_v33, %v1536_v54  ;;  %v3427_v36 = vsub.f32 %v3236_v39, %v1488_v16 }
 0x2e0   :  { %3894 = vst [vmem:[#allocation38_spill] sm:$0xff] %v3415_v25  ;;  %v3424_v24 = vsel %vm1413_vm9, %v2470_v38, %v1410_v49  ;;  %v1540_v11 = vadd.f32 %v1539_v27, %v1515_v26  ;;  %v1508_v21 = vmul.f32 %v3410_v8, %v3410_v8  ;;  %v3435_v54 = vsub.f32 %v3290_v58, %v1488_v16  ;;  %v3447_v26 = vpop.f32.mrf.mxu3 }
 0x2e1   :  { %3895 = vst [vmem:[#allocation39_spill] sm:$0xff] %v3424_v24  ;;  %v1439_v7 = vmul.f32 %v3424_v24, %v3219_v45  ;;  %v1417_v41 = vmul.f32 %v2472_v59, %v1416_v57  ;;  %2473 = vrsqrt.f32 %v3420_v9  ;;  %v1558_v38 = vmul.f32 %v1538_v20, %v2959_v40 }
 0x2e2   :  { %3896 = vst [vmem:[#allocation40_spill] sm:$0xff] %v3427_v36  ;;  %v1541_v31 = vadd.f32 %v1540_v11, %v1519_v0  ;;  %v1512_v39 = vmul.f32 %v3415_v25, %v3415_v25  ;;  %vm1422_vm11 = vweird.f32 %v2472_v59  ;;  %v1636_v46 = vrot.slane %v1635_v44, 1 }
 0x2e3   :  { %v1418_v1 = vmul.f32 0.5, %v1417_v41  ;;  %v1641_v45 = vrot.slane %v1640_v34, 4  ;;  %v3443_v33 = vadd.f32 1e-05, %v1558_v38  ;;  %v1516_v58 = vmul.f32 %v3427_v36, %v3427_v36  ;;  %vm1423_vm12 = vmor %vm1421_vm10, %vm1422_vm11 }
 0x2e4   :  { %v1542_v49 = vrot.slane %v1541_v31, 4  ;;  %v1548_v16 = vadd.f32 %v1512_v39, %v1508_v21  ;;  %v1520_v57 = vmul.f32 %v3435_v54, %v3435_v54  ;;  %v1637_v20 = vadd.f32 %v1636_v46, %v1635_v44 }
 0x2e5   :  { %v1419_v27 = vsub.f32 1.5, %v1418_v1  ;;  %v1642_v0 = vadd.f32 %v1641_v45, %v1640_v34  ;;  %2475 = vrsqrt.f32 %v3443_v33  ;;  %v1647_v38 = vadd.f32 %v3387_v42, %v3355_v12 }
 0x2e6   :  { %v1543_v11 = vadd.f32 %v1542_v49, %v1541_v31  ;;  %v1549_v41 = vadd.f32 %v1548_v16, %v1516_v58  ;;  %v1665_v19 = vmul.f32 %v1637_v20, %v2959_v40  ;;  %v1656_v39 = vadd.f32 %v3398_v43, %v3362_v13 }
 0x2e7   :  { %v2474_v47 = vpop.eup %2473  ;;  %v1420_v24 = vmul.f32 %v2472_v59, %v1419_v27  ;;  %v1643_v21 = vrot.slane %v1642_v0, 2  ;;  %vm1571_vm13 = vweird.f32 %v3420_v9  ;;  %v1648_v1 = vadd.f32 %v1647_v38, %v3441_v63 }
 0x2e8   :  { %v1566_v34 = vmul.f32 %v2474_v47, %v3420_v9  ;;  %v1544_v44 = vrot.slane %v1543_v11, 2  ;;  %v1550_v31 = vadd.f32 %v1549_v41, %v1520_v57  ;;  %v3466_v45 = vsub.f32 %v3203_v32, %v1665_v19 }
 0x2e9   :  { %v3463_v46 = vsel %vm1423_vm12, %v2472_v59, %v1420_v24  ;;  %v3469_v49 = vsub.f32 %v3245_v23, %v1665_v19  ;;  %v3472_v58 = vsub.f32 %v3301_v53, %v1665_v19  ;;  %vm1572_vm14 = vweird.f32 %v2474_v47 }
 0x2ea   :  { %3897 = vst [vmem:[#allocation41_spill] sm:$0xff] %v3463_v46  ;;  %v1440_v28 = vmul.f32 %v3463_v46, %v3269_v30  ;;  %v1567_v16 = vmul.f32 %v2474_v47, %v1566_v34  ;;  %v1545_v27 = vadd.f32 %v1544_v44, %v1543_v11  ;;  %v1551_v20 = vrot.slane %v1550_v31, 4  ;;  %v3485_v30 = vpop.f32.mrf.mxu2  ;;  %vm1573_vm0 = vmor %vm1571_vm13, %vm1572_vm14 }
 0x2eb   :  { %v3477_v57 = vsub.f32 %v3357_v37, %v1665_v19  ;;  %v1685_v32 = vmul.f32 %v3466_v45, %v3466_v45  ;;  %v1689_v23 = vmul.f32 %v3469_v49, %v3469_v49  ;;  %v2476_v59 = vpop.eup %2475  ;;  %vm1581_vm15 = vweird.f32 %v3443_v33 }
 0x2ec   :  { %v3483_v24 = vpack.c.bf16 %v1440_v28, %v1439_v7  ;;  %v1568_v53 = vmul.f32 0.5, %v1567_v16  ;;  %v1546_v41 = vrot.slane %v1545_v27, 1  ;;  %v1552_v38 = vadd.f32 %v1551_v20, %v1550_v31  ;;  %v3493_v16 = vpop.f32.mrf.mxu3 }
 0x2ed   :  { %v1576_v11 = vmul.f32 %v2476_v59, %v3443_v33  ;;  %v1693_v19 = vmul.f32 %v3472_v58, %v3472_v58  ;;  %v1697_v37 = vmul.f32 %v3477_v57, %v3477_v57  ;;  %v1701_v34 = vadd.f32 %v1689_v23, %v1685_v32 }
 0x2ee   :  { %3898 = vst [vmem:[#allocation42_spill] sm:$0xff] %v3483_v24  ;;  %v1569_v44 = vsub.f32 1.5, %v1568_v53  ;;  %v1547_v46 = vadd.f32 %v1546_v41, %v1545_v27  ;;  %v1553_v7 = vrot.slane %v1552_v38, 2  ;;  %v1644_v28 = vadd.f32 %v1643_v21, %v1642_v0 }
 0x2ef   :  { %v1577_v31 = vmul.f32 %v2476_v59, %v1576_v11  ;;  %v1702_v20 = vadd.f32 %v1701_v34, %v1693_v19  ;;  %v1657_v24 = vadd.f32 %v1656_v39, %v3447_v26  ;;  %v1649_v25 = vadd.f32 %v1648_v1, %v3485_v30 }
 0x2f0   :  { %v1570_v55 = vmul.f32 %v2474_v47, %v1569_v44  ;;  %v1559_v8 = vmul.f32 %v1547_v46, %v2959_v40  ;;  %v1554_v18 = vadd.f32 %v1553_v7, %v1552_v38  ;;  %v1645_v36 = vrot.slane %v1644_v28, 1 }
 0x2f1   :  { %v1578_v27 = vmul.f32 0.5, %v1577_v31  ;;  %v1703_v32 = vadd.f32 %v1702_v20, %v1697_v37  ;;  %v1650_v0 = vrot.slane %v1649_v25, 4  ;;  %v1658_v21 = vadd.f32 %v1657_v24, %v3493_v16 }
 0x2f2   :  { %v3502_v23 = vsel %vm1573_vm0, %v2474_v47, %v1570_v55  ;;  %v3504_v53 = vadd.f32 1e-05, %v1559_v8  ;;  %v1555_v39 = vrot.slane %v1554_v18, 1  ;;  %v1646_v1 = vadd.f32 %v1645_v36, %v1644_v28 }
 0x2f3   :  { %v1579_v41 = vsub.f32 1.5, %v1578_v27  ;;  %vm1582_vm1 = vweird.f32 %v2476_v59  ;;  %v1704_v46 = vrot.slane %v1703_v32, 4  ;;  %v1651_v38 = vadd.f32 %v1650_v0, %v1649_v25 }
 0x2f4   :  { %v1617_v11 = vmul.f32 %v3502_v23, %v3315_v35  ;;  %2477 = vrsqrt.f32 %v3504_v53  ;;  %v1556_v9 = vadd.f32 %v1555_v39, %v1554_v18  ;;  %v1666_v19 = vmul.f32 %v1646_v1, %v2959_v40  ;;  %vm1583_vm2 = vmor %vm1581_vm15, %vm1582_vm1 }
 0x2f5   :  { %v1580_v37 = vmul.f32 %v2476_v59, %v1579_v41  ;;  %v1705_v24 = vadd.f32 %v1704_v46, %v1703_v32  ;;  %v1652_v47 = vrot.slane %v1651_v38, 2  ;;  %v1659_v55 = vrot.slane %v1658_v21, 4 }
 0x2f6   :  { %v1560_v8 = vmul.f32 %v1556_v9, %v2959_v40  ;;  %v3514_v36 = vsub.f32 %v3230_v15, %v1666_v19  ;;  %v3517_v25 = vsub.f32 %v3286_v6, %v1666_v19  ;;  %v3520_v35 = vsub.f32 %v3342_v51, %v1666_v19 }
 0x2f7   :  { %v3522_v18 = vsel %vm1583_vm2, %v2476_v59, %v1580_v37  ;;  %v1706_v34 = vrot.slane %v1705_v24, 2  ;;  %v3525_v44 = vsub.f32 %v3378_v4, %v1666_v19  ;;  %v1653_v7 = vadd.f32 %v1652_v47, %v1651_v38 }
 0x2f8   :  { %v1618_v33 = vmul.f32 %v3522_v18, %v3351_v29  ;;  %v3529_v28 = vadd.f32 1e-05, %v1560_v8  ;;  %v1686_v15 = vmul.f32 %v3514_v36, %v3514_v36  ;;  %v1690_v6 = vmul.f32 %v3517_v25, %v3517_v25 }
 0x2f9   :  { %v1707_v51 = vadd.f32 %v1706_v34, %v1705_v24  ;;  %v1654_v31 = vrot.slane %v1653_v7, 1  ;;  %v1694_v4 = vmul.f32 %v3520_v35, %v3520_v35  ;;  %v1698_v0 = vmul.f32 %v3525_v44, %v3525_v44 }
 0x2fa   :  { %v2478_v59 = vpop.eup %2477  ;;  %v1627_v20 = vpack.c.bf16 %v1618_v33, %v1617_v11  ;;  %2479 = vrsqrt.f32 %v3529_v28  ;;  %v1710_v27 = vadd.f32 %v1690_v6, %v1686_v15  ;;  %v1660_v41 = vadd.f32 %v1659_v55, %v1658_v21 }
 0x2fb   :  { %v1586_v29 = vmul.f32 %v2478_v59, %v3504_v53  ;;  %v1708_v32 = vrot.slane %v1707_v51, 1  ;;  %v1655_v39 = vadd.f32 %v1654_v31, %v1653_v7  ;;  %v1613_v46 = vmul.f32 %v3502_v23, %v3312_v14 }
 0x2fc   :  { %v1711_v1 = vadd.f32 %v1710_v27, %v1694_v4  ;;  %v1614_v38 = vmul.f32 %v3522_v18, %v3340_v17  ;;  %vm1591_vm3 = vweird.f32 %v3504_v53  ;;  %vm1592_vm4 = vweird.f32 %v2478_v59 }
 0x2fd   :  { %v1587_v11 = vmul.f32 %v2478_v59, %v1586_v29  ;;  %v1709_v9 = vadd.f32 %v1708_v32, %v1707_v51  ;;  %v1667_v19 = vmul.f32 %v1655_v39, %v2959_v40  ;;  %v1661_v24 = vrot.slane %v1660_v41, 2  ;;  %vm1593_vm7 = vmor %vm1591_vm3, %vm1592_vm4 }
 0x2fe   :  { %v1712_v37 = vadd.f32 %v1711_v1, %v1698_v0  ;;  %v1625_v47 = vpack.c.bf16 %v1614_v38, %v1613_v46  ;;  %v1909_v15 = vunpack.c.l.b16 %v1627_v20  ;;  %vm1601_vm5 = vweird.f32 %v3529_v28 }
 0x2ff   :  { %v1588_v8 = vmul.f32 0.5, %v1587_v11  ;;  %v1737_v34 = vmul.f32 %v1709_v9, %v2959_v40  ;;  %v3549_v21 = vsub.f32 %v3355_v12, %v1667_v19  ;;  %v3552_v14 = vsub.f32 %v3387_v42, %v1667_v19 }
 0x300   :  { %v2480_v17 = vpop.eup %2479  ;;  %v1713_v55 = vrot.slane %v1712_v37, 4  ;;  %v3555_v7 = vsub.f32 %v3441_v63, %v1667_v19  ;;  %v1662_v33 = vadd.f32 %v1661_v24, %v1660_v41  ;;  %v3562_v12 = vsub.f32 %v3485_v30, %v1667_v19 }
 0x301   :  { %v1589_v6 = vsub.f32 1.5, %v1588_v8  ;;  %v1596_v51 = vmul.f32 %v2480_v17, %v3529_v28  ;;  %v3559_v31 = vadd.f32 1e-05, %v1737_v34  ;;  %v1687_v42 = vmul.f32 %v3549_v21, %v3549_v21 }
 0x302   :  { %v1714_v4 = vadd.f32 %v1713_v55, %v1712_v37  ;;  %v1691_v63 = vmul.f32 %v3552_v14, %v3552_v14  ;;  %v1910_v27 = vunpack.c.h.b16 %v1627_v20  ;;  %vm1602_vm6 = vweird.f32 %v2480_v17 }
 0x303   :  { %v1590_v29 = vmul.f32 %v2478_v59, %v1589_v6  ;;  %v1597_v32 = vmul.f32 %v2480_v17, %v1596_v51  ;;  %2481 = vrsqrt.f32 %v3559_v31  ;;  %v1695_v39 = vmul.f32 %v3555_v7, %v3555_v7  ;;  %vm1603_vm8 = vmor %vm1601_vm5, %vm1602_vm6 }
 0x304   :  { %v1715_v0 = vrot.slane %v1714_v4, 2  ;;  %v1719_v1 = vadd.f32 %v1691_v63, %v1687_v42  ;;  %v1663_v30 = vrot.slane %v1662_v33, 1  ;;  %v1699_v46 = vmul.f32 %v3562_v12, %v3562_v12 }
 0x305   :  { %v1598_v41 = vmul.f32 0.5, %v1597_v32  ;;  %v1905_v20 = vunpack.c.l.b16 %v1625_v47  ;;  %v1906_v38 = vunpack.c.h.b16 %v1625_v47  ;;  %v3576_v11 = vsel %vm1593_vm7, %v2478_v59, %v1590_v29 }
 0x306   :  { %v1716_v9 = vadd.f32 %v1715_v0, %v1714_v4  ;;  %v1720_v19 = vadd.f32 %v1719_v1, %v1695_v39  ;;  %v1664_v37 = vadd.f32 %v1663_v30, %v1662_v33  ;;  %v1605_v53 = vmul.f32 %v3502_v23, %v3306_v2 }
 0x307   :  { %v1599_v24 = vsub.f32 1.5, %v1598_v41  ;;  %v3578_v8 = vpack.c.b16 %v1909_v15, %v1905_v20  ;;  %v3580_v34 = vpack.c.b16 %v1910_v27, %v1906_v38  ;;  %v1606_v47 = vmul.f32 %v3522_v18, %v3325_v52 }
 0x308   :  { %v1717_v55 = vrot.slane %v1716_v9, 1  ;;  %v1721_v6 = vadd.f32 %v1720_v19, %v1699_v46  ;;  %v1668_v51 = vmul.f32 %v1664_v37, %v2959_v40  ;;  %v1609_v33 = vmul.f32 %v3502_v23, %v3309_v10 }
 0x309   :  { %v2482_v59 = vpop.eup %2481  ;;  %v1600_v42 = vmul.f32 %v2480_v17, %v1599_v24  ;;  %v1610_v15 = vmul.f32 %v3522_v18, %v3337_v56  ;;  %v1433_v4 = vmul.f32 %v3327_v50, %v3118_v22  ;;  %v1619_v2 = vmul.f32 %v3576_v11, %v3401_v61 }
 0x30a   :  { %v1746_v52 = vmul.f32 %v2482_v59, %v3559_v31  ;;  %vm1751_vm9 = vweird.f32 %v3559_v31  ;;  %v1718_v63 = vadd.f32 %v1717_v55, %v1716_v9  ;;  %v1722_v27 = vrot.slane %v1721_v6, 4 }
 0x30b   :  { %v3600_v10 = vsel %vm1603_vm8, %v2480_v17, %v1600_v42  ;;  %v3603_v56 = vsub.f32 %v3362_v13, %v1668_v51  ;;  %v3606_v22 = vsub.f32 %v3398_v43, %v1668_v51  ;;  %v3609_v61 = vsub.f32 %v3447_v26, %v1668_v51 }
 0x30c   :  { %v1620_v23 = vmul.f32 %v3600_v10, %v3435_v54  ;;  %v1747_v18 = vmul.f32 %v2482_v59, %v1746_v52  ;;  %v1738_v28 = vmul.f32 %v1718_v63, %v2959_v40  ;;  %v1723_v29 = vadd.f32 %v1722_v27, %v1721_v6 }
 0x30d   :  { %vm1752_vm10 = vweird.f32 %v2482_v59  ;;  %v3615_v17 = vsub.f32 %v3493_v16, %v1668_v51  ;;  %v1688_v13 = vmul.f32 %v3603_v56, %v3603_v56  ;;  %v1692_v43 = vmul.f32 %v3606_v22, %v3606_v22 }
 0x30e   :  { %v3621_v32 = vpack.c.bf16 %v1620_v23, %v1619_v2  ;;  %v1748_v26 = vmul.f32 0.5, %v1747_v18  ;;  %v3623_v0 = vadd.f32 1e-05, %v1738_v28  ;;  %v1724_v54 = vrot.slane %v1723_v29, 2  ;;  %vm1753_vm11 = vmor %vm1751_vm9, %vm1752_vm10 }
 0x30f   :  { %v1696_v39 = vmul.f32 %v3609_v61, %v3609_v61  ;;  %v1728_v1 = vadd.f32 %v1692_v43, %v1688_v13  ;;  %v1621_v30 = vpack.c.bf16 %v1606_v47, %v1605_v53  ;;  %v1623_v41 = vpack.c.bf16 %v1610_v15, %v1609_v33 }
 0x310   :  { %v1749_v16 = vsub.f32 1.5, %v1748_v26  ;;  %2483 = vrsqrt.f32 %v3623_v0  ;;  %v1725_v46 = vadd.f32 %v1724_v54, %v1723_v29  ;;  %v1700_v20 = vmul.f32 %v3615_v17, %v3615_v17  ;;  %v3899_v54 = vld [vmem:[#allocation22_spill] sm:$0xff] }
 0x311   :  { %v1729_v38 = vadd.f32 %v1728_v1, %v1696_v39  ;;  %v1897_v9 = vunpack.c.l.b16 %v1621_v30  ;;  %v1901_v19 = vunpack.c.l.b16 %v1623_v41  ;;  %v1898_v37 = vunpack.c.h.b16 %v1621_v30  ;;  %v3900_v30 = vld [vmem:[#allocation20_spill] sm:$0xff] }
 0x312   :  { %v1750_v24 = vmul.f32 %v2482_v59, %v1749_v16  ;;  %v1726_v55 = vrot.slane %v1725_v46, 1  ;;  %v1902_v6 = vunpack.c.h.b16 %v1623_v41  ;;  %v1434_v51 = vmul.f32 %v3369_v60, %v3166_v48  ;;  %v3901_v16 = vld [vmem:[#allocation23_spill] sm:$0xff] }
 0x313   :  { %v1730_v53 = vadd.f32 %v1729_v38, %v1700_v20  ;;  %v3635_v47 = vpack.c.b16 %v1901_v19, %v1897_v9  ;;  %v1869_v42 = vunpack.c.l.b16 %v3376_v3  ;;  %v1870_v33 = vunpack.c.h.b16 %v3376_v3  ;;  %v3903_v20 = vld [vmem:[#allocation21_spill] sm:$0xff] }
 0x314   :  { %v1754_v15 = vsel %vm1753_vm11, %v2482_v59, %v1750_v24  ;;  %v1727_v2 = vadd.f32 %v1726_v55, %v1725_v46  ;;  %v3639_v52 = vpack.c.b16 %v1902_v6, %v1898_v37  ;;  %v1445_v63 = vpack.c.bf16 %v1434_v51, %v1433_v4  ;;  %v3902_v46 = vld [vmem:[#allocation10_spill] sm:$0xff]  ;;  %v3904_v24 = vld [vmem:[#allocation13_spill] sm:$0xff]  ;;  %v3905_v55 = vld [vmem:[#allocation24_spill] sm:$0xff] }
 0x315   :  { %v3642_v27 = vmul.f32 %v1754_v15, %v3472_v58  ;;  %v1797_v48 = vmul.f32 %v1754_v15, %v3477_v57  ;;  %v1731_v23 = vrot.slane %v1730_v53, 4  ;;  %v1785_v28 = vmul.f32 %v1754_v15, %v3466_v45 }
 0x316   :  { %v2484_v31 = vpop.eup %2483  ;;  %v1739_v18 = vmul.f32 %v1727_v2, %v2959_v40  ;;  %v1865_v29 = vunpack.c.l.b16 %v1445_v63  ;;  %v1866_v13 = vunpack.c.h.b16 %v1445_v63  ;;  %vm1761_vm12 = vweird.f32 %v3623_v0 }
 0x317   :  { %v1756_v3 = vmul.f32 %v2484_v31, %v3623_v0  ;;  %v1732_v59 = vadd.f32 %v1731_v23, %v1730_v53  ;;  %v1789_v4 = vmul.f32 %v1754_v15, %v3469_v49  ;;  %v1425_v58 = vmul.f32 %v3327_v50, %v3112_v5 }
 0x318   :  { %v3652_v43 = vadd.f32 1e-05, %v1739_v18  ;;  %v3654_v57 = vpack.c.b16 %v1869_v42, %v1865_v29  ;;  %v3656_v26 = vpack.c.b16 %v1870_v33, %v1866_v13  ;;  %v1426_v45 = vmul.f32 %v3369_v60, %v3899_v54  ;;  %v3906_v42 = vld [vmem:[#allocation25_spill] sm:$0xff]  ;;  %v3907_v18 = vld [vmem:[#allocation8_spill] sm:$0xff]  ;;  %v3908_v13 = vld [vmem:[#allocation11_spill] sm:$0xff] }
 0x319   :  { %v1757_v39 = vmul.f32 %v2484_v31, %v1756_v3  ;;  %v1733_v1 = vrot.slane %v1732_v59, 2  ;;  %v1429_v41 = vmul.f32 %v3327_v50, %v3900_v30  ;;  %v1430_v49 = vmul.f32 %v3369_v60, %v3901_v16 }
 0x31a   :  { %vm1762_vm13 = vweird.f32 %v2484_v31  ;;  %2485 = vrsqrt.f32 %v3652_v43  ;;  %v1441_v5 = vpack.c.bf16 %v1426_v45, %v1425_v58  ;;  %v1253_v38 = vmul.f32 %v3903_v20, %v3902_v46 }
 0x31b   :  { %v1758_v9 = vmul.f32 0.5, %v1757_v39  ;;  %v1734_v19 = vadd.f32 %v1733_v1, %v1732_v59  ;;  %v1443_v37 = vpack.c.bf16 %v1430_v49, %v1429_v41  ;;  %v1254_v6 = vmul.f32 %v3905_v55, %v3904_v24  ;;  %v3909_v59 = vld [vmem:[#allocation9_spill] sm:$0xff]  ;;  %vm1763_vm14 = vmor %vm1761_vm12, %vm1762_vm13  ;;  %v3910_v49 = vld [vmem:[#allocation12_spill] sm:$0xff] }
 0x31c   :  { %v1857_v51 = vunpack.c.l.b16 %v1441_v5  ;;  %v1858_v53 = vunpack.c.h.b16 %v1441_v5  ;;  %v1829_v50 = vunpack.c.l.b16 %v3906_v42  ;;  %v1830_v33 = vunpack.c.h.b16 %v3906_v42 }
 0x31d   :  { %v1759_v60 = vsub.f32 1.5, %v1758_v9  ;;  %v1735_v15 = vrot.slane %v1734_v19, 1  ;;  %v1861_v2 = vunpack.c.l.b16 %v1443_v37  ;;  %v1862_v63 = vunpack.c.h.b16 %v1443_v37 }
 0x31e   :  { %v1265_v23 = vpack.c.bf16 %v1254_v6, %v1253_v38  ;;  %v1245_v29 = vmul.f32 %v3903_v20, %v3907_v18  ;;  %v1246_v3 = vmul.f32 %v3905_v55, %v3908_v13  ;;  %v1249_v58 = vmul.f32 %v3903_v20, %v3909_v59 }
 0x31f   :  { %v1760_v54 = vmul.f32 %v2484_v31, %v1759_v60  ;;  %v1736_v45 = vadd.f32 %v1735_v15, %v1734_v19  ;;  %v3677_v39 = vpack.c.b16 %v1861_v2, %v1857_v51  ;;  %v3679_v1 = vpack.c.b16 %v1862_v63, %v1858_v53 }
 0x320   :  { %v2486_v30 = vpop.eup %2485  ;;  %v1825_v41 = vunpack.c.l.b16 %v1265_v23  ;;  %v1826_v16 = vunpack.c.h.b16 %v1265_v23  ;;  %v1250_v5 = vmul.f32 %v3905_v55, %v3910_v49  ;;  %v3686_v46 = vpack.c.bf16 %v1246_v3, %v1245_v29 }
 0x321   :  { %v1764_v38 = vsel %vm1763_vm14, %v2484_v31, %v1760_v54  ;;  %v1766_v20 = vmul.f32 %v2486_v30, %v3652_v43  ;;  %vm1771_vm15 = vweird.f32 %v3652_v43  ;;  %v1740_v9 = vmul.f32 %v1736_v45, %v2959_v40 }
 0x322   :  { %v1794_v19 = vmul.f32 %v1764_v38, %v3520_v35  ;;  %v1798_v37 = vmul.f32 %v1764_v38, %v3525_v44  ;;  %v1786_v0 = vmul.f32 %v1764_v38, %v3514_v36  ;;  %v1790_v24 = vmul.f32 %v1764_v38, %v3517_v25 }
 0x323   :  { %v1767_v6 = vmul.f32 %v2486_v30, %v1766_v20  ;;  %v3695_v51 = vadd.f32 1e-05, %v1740_v9  ;;  %v3697_v55 = vpack.c.b16 %v1829_v50, %v1825_v41  ;;  %v3699_v31 = vpack.c.b16 %v1830_v33, %v1826_v16  ;;  %v3912_v20 = vld [vmem:[#allocation35_spill] sm:$0xff] }
 0x324   :  { %v1807_v53 = vpack.c.bf16 %v1798_v37, %v1797_v48  ;;  %v1805_v42 = vpack.c.bf16 %v1794_v19, %v3642_v27  ;;  %v1801_v60 = vpack.c.bf16 %v1786_v0, %v1785_v28  ;;  %v1803_v40 = vpack.c.bf16 %v1790_v24, %v1789_v4  ;;  %v3911_v28 = vld [vmem:[#allocation40_spill] sm:$0xff]  ;;  %v3913_v19 = vld [vmem:[#allocation37_spill] sm:$0xff] }
 0x325   :  { %v1768_v15 = vmul.f32 0.5, %v1767_v6  ;;  %vm1772_vm0 = vweird.f32 %v2486_v30  ;;  %2487 = vrsqrt.f32 %v3695_v51  ;;  %v1615_v36 = vmul.f32 %v3576_v11, %v3396_v62 }
 0x326   :  { %v1949_v25 = vunpack.c.l.b16 %v1807_v53  ;;  %v1950_v35 = vunpack.c.h.b16 %v1807_v53  ;;  %v1945_v44 = vunpack.c.l.b16 %v1805_v42  ;;  %v1946_v2 = vunpack.c.h.b16 %v1805_v42  ;;  %vm1773_vm1 = vmor %vm1771_vm15, %vm1772_vm0  ;;  %v3914_v42 = vld [vmem:[#allocation36_spill] sm:$0xff] }
 0x327   :  { %v1769_v50 = vsub.f32 1.5, %v1768_v15  ;;  %v1937_v63 = vunpack.c.l.b16 %v1801_v60  ;;  %v1941_v33 = vunpack.c.l.b16 %v1803_v40  ;;  %v1938_v23 = vunpack.c.h.b16 %v1801_v60 }
 0x328   :  { %v1957_v48 = vpack.c.b16 %v1949_v25, %v1945_v44  ;;  %v1958_v18 = vpack.c.b16 %v1950_v35, %v1946_v2  ;;  %v1942_v27 = vunpack.c.h.b16 %v1803_v40  ;;  %v1616_v4 = vmul.f32 %v3600_v10, %v3911_v28  ;;  %v3915_v40 = vld [vmem:[#allocation38_spill] sm:$0xff]  ;;  %v3916_v35 = vld [vmem:[#allocation28_spill] sm:$0xff]  ;;  %v3917_v44 = vld [vmem:[#allocation39_spill] sm:$0xff] }
 0x329   :  { %v1770_v29 = vmul.f32 %v2486_v30, %v1769_v50  ;;  %v1953_v13 = vpack.c.b16 %v1941_v33, %v1937_v63  ;;  %v1911_v3 = vunpack.c.l.b16 %v3621_v32  ;;  %v1912_v62 = vunpack.c.h.b16 %v3621_v32 }
 0x32a   :  { %2009 = vmatpush.bf16.msrb.mxu0 %v1957_v48  ;;  %2028 = vmatpush.bf16.msrb.mxu1 %v1958_v18  ;;  %v1954_v59 = vpack.c.b16 %v1942_v27, %v1938_v23  ;;  %v1626_v54 = vpack.c.bf16 %v1616_v4, %v1615_v36  ;;  %v1263_v45 = vpack.c.bf16 %v1250_v5, %v1249_v58  ;;  %v1817_v41 = vunpack.c.l.b16 %v3686_v46  ;;  %v3919_v23 = vld [vmem:[#allocation41_spill] sm:$0xff]  ;;  %v3921_v4 = vld [vmem:[#allocation26_spill] sm:$0xff] }
 0x32b   :  { %v2488_v16 = vpop.eup %2487  ;;  %v1774_v49 = vsel %vm1773_vm1, %v2486_v30, %v1770_v29  ;;  %v1818_v38 = vunpack.c.h.b16 %v3686_v46  ;;  %v1607_v9 = vmul.f32 %v3576_v11, %v3912_v20  ;;  %v1608_v32 = vmul.f32 %v3600_v10, %v3913_v19  ;;  %v3926_v20 = vld [vmem:[#allocation29_spill] sm:$0xff] }
 0x32c   :  { %v1795_v43 = vmul.f32 %v1774_v49, %v3555_v7  ;;  %v1799_v37 = vmul.f32 %v1774_v49, %v3562_v12  ;;  %v1776_v0 = vmul.f32 %v2488_v16, %v3695_v51  ;;  %vm1781_vm2 = vweird.f32 %v3695_v51 }
 0x32d   :  { %vm1782_vm3 = vweird.f32 %v2488_v16  ;;  %v1787_v58 = vmul.f32 %v1774_v49, %v3549_v21  ;;  %v1791_v30 = vmul.f32 %v1774_v49, %v3552_v14  ;;  %v1907_v5 = vunpack.c.l.b16 %v1626_v54 }
 0x32e   :  { %v1908_v46 = vunpack.c.h.b16 %v1626_v54  ;;  %v1777_v24 = vmul.f32 %v2488_v16, %v1776_v0  ;;  %2010 = vmatpush.bf16.msrb.mxu0 %v1953_v13  ;;  %2029 = vmatpush.bf16.msrb.mxu1 %v1954_v59  ;;  %v1821_v6 = vunpack.c.l.b16 %v1263_v45  ;;  %v1822_v53 = vunpack.c.h.b16 %v1263_v45  ;;  %v3922_v59 = vld [vmem:[#allocation32_spill] sm:$0xff]  ;;  %vm1783_vm4 = vmor %vm1781_vm2, %vm1782_vm3 }
 0x32f   :  { %v1611_v7 = vmul.f32 %v3576_v11, %v3914_v42  ;;  %v3726_v12 = vpack.c.b16 %v1911_v3, %v1907_v5  ;;  %v1612_v15 = vmul.f32 %v3600_v10, %v3915_v40  ;;  %v1622_v21 = vpack.c.bf16 %v1608_v32, %v1607_v9  ;;  %v3918_v11 = vld [vmem:[#allocation34_spill] sm:$0xff] }
 0x330   :  { %v3728_v60 = vpack.c.b16 %v1912_v62, %v1908_v46  ;;  %v1778_v36 = vmul.f32 0.5, %v1777_v24  ;;  %v3732_v14 = vpack.c.b16 %v1821_v6, %v1817_v41  ;;  %v3734_v25 = vpack.c.b16 %v1822_v53, %v1818_v38  ;;  %v3920_v10 = vld [vmem:[#allocation42_spill] sm:$0xff]  ;;  %v3923_v41 = vld [vmem:[#allocation27_spill] sm:$0xff]  ;;  %v3925_v38 = vld [vmem:[#allocation16_spill] sm:$0xff] }
 0x331   :  { %v1435_v2 = vmul.f32 %v3917_v44, %v3916_v35  ;;  %v1624_v50 = vpack.c.bf16 %v1612_v15, %v1611_v7  ;;  %v1899_v63 = vunpack.c.l.b16 %v1622_v21  ;;  %v1900_v33 = vunpack.c.h.b16 %v1622_v21  ;;  %v3927_v53 = vld [vmem:[#allocation31_spill] sm:$0xff] }
 0x332   :  { %v1436_v48 = vmul.f32 %v3919_v23, %v3918_v11  ;;  %v1779_v18 = vsub.f32 1.5, %v1778_v36  ;;  %2011 = vmatpush.bf16.msrb.mxu0 %v3578_v8  ;;  %2030 = vmatpush.bf16.msrb.mxu1 %v3580_v34  ;;  %v1871_v27 = vunpack.c.l.b16 %v3920_v10  ;;  %v1872_v28 = vunpack.c.h.b16 %v3920_v10  ;;  %v3924_v8 = vld [vmem:[#allocation33_spill] sm:$0xff] }
 0x333   :  { %v1427_v29 = vmul.f32 %v3917_v44, %v3921_v4  ;;  %v1903_v13 = vunpack.c.l.b16 %v1624_v50  ;;  %v1904_v3 = vunpack.c.h.b16 %v1624_v50  ;;  %v1428_v54 = vmul.f32 %v3919_v23, %v3922_v59  ;;  %v3932_v59 = vld [vmem:[#allocation15_spill] sm:$0xff] }
 0x334   :  { %v1446_v62 = vpack.c.bf16 %v1436_v48, %v1435_v2  ;;  %v1780_v45 = vmul.f32 %v2488_v16, %v1779_v18  ;;  %v1431_v49 = vmul.f32 %v3917_v44, %v3923_v41  ;;  %v1432_v34 = vmul.f32 %v3919_v23, %v3924_v8  ;;  %v3933_v41 = vld [vmem:[#allocation18_spill] sm:$0xff] }
 0x335   :  { %v1255_v9 = vmul.f32 %v3926_v20, %v3925_v38  ;;  %v3757_v19 = vpack.c.b16 %v1903_v13, %v1899_v63  ;;  %v3759_v32 = vpack.c.b16 %v1904_v3, %v1900_v33  ;;  %v1442_v24 = vpack.c.bf16 %v1428_v54, %v1427_v29  ;;  %v3929_v33 = vld [vmem:[#allocation30_spill] sm:$0xff]  ;;  %v3931_v3 = vld [vmem:[#allocation17_spill] sm:$0xff] }
 0x336   :  { %v1867_v0 = vunpack.c.l.b16 %v1446_v62  ;;  %v1868_v5 = vunpack.c.h.b16 %v1446_v62  ;;  %v1784_v46 = vsel %vm1783_vm4, %v2488_v16, %v1780_v45  ;;  %2012 = vmatpush.bf16.msrb.mxu0 %v3635_v47  ;;  %2031 = vmatpush.bf16.msrb.mxu1 %v3639_v52  ;;  %v1444_v6 = vpack.c.bf16 %v1432_v34, %v1431_v49 }
 0x337   :  { %v1831_v42 = vunpack.c.l.b16 %v3927_v53  ;;  %v1796_v7 = vmul.f32 %v1784_v46, %v3609_v61  ;;  %v1800_v51 = vmul.f32 %v1784_v46, %v3615_v17  ;;  %v1788_v40 = vmul.f32 %v1784_v46, %v3603_v56  ;;  %v3928_v17 = vld [vmem:[#allocation19_spill] sm:$0xff] }
 0x338   :  { %v1792_v15 = vmul.f32 %v1784_v46, %v3606_v22  ;;  %v1879_v21 = vpack.c.b16 %v1871_v27, %v1867_v0  ;;  %v1880_v36 = vpack.c.b16 %v1872_v28, %v1868_v5  ;;  %v1859_v35 = vunpack.c.l.b16 %v1442_v24  ;;  %v3930_v28 = vld [vmem:[#allocation14_spill] sm:$0xff] }
 0x339   :  { %v1863_v16 = vunpack.c.l.b16 %v1444_v6  ;;  %v1808_v44 = vpack.c.bf16 %v1800_v51, %v1799_v37  ;;  %v1806_v47 = vpack.c.bf16 %v1796_v7, %v1795_v43  ;;  %v1802_v2 = vpack.c.bf16 %v1788_v40, %v1787_v58  ;;  %v1995_v40 = vpop.permute.xlu1 %1994 }
 0x33a   :  { %v1804_v52 = vpack.c.bf16 %v1792_v15, %v1791_v30  ;;  %2013 = vmatpush.bf16.msrb.mxu0 %v3654_v57  ;;  %2032 = vmatpush.bf16.msrb.mxu1 %v3656_v26  ;;  %v1860_v61 = vunpack.c.h.b16 %v1442_v24  ;;  %v1864_v63 = vunpack.c.h.b16 %v1444_v6  ;;  %v1256_v56 = vmul.f32 %v3929_v33, %v3928_v17 }
 0x33b   :  { %v1875_v50 = vpack.c.b16 %v1863_v16, %v1859_v35  ;;  %v1951_v11 = vunpack.c.l.b16 %v1808_v44  ;;  %v1952_v22 = vunpack.c.h.b16 %v1808_v44  ;;  %v1947_v23 = vunpack.c.l.b16 %v1806_v47 }
 0x33c   :  { %v1948_v48 = vunpack.c.h.b16 %v1806_v47  ;;  %v1939_v18 = vunpack.c.l.b16 %v1802_v2  ;;  %v1943_v10 = vunpack.c.l.b16 %v1804_v52  ;;  %v1940_v37 = vunpack.c.h.b16 %v1802_v2 }
 0x33d   :  { %v1944_v43 = vunpack.c.h.b16 %v1804_v52  ;;  %v1959_v58 = vpack.c.b16 %v1951_v11, %v1947_v23  ;;  %v1876_v27 = vpack.c.b16 %v1864_v63, %v1860_v61  ;;  %v1266_v57 = vpack.c.bf16 %v1256_v56, %v1255_v9 }
 0x33e   :  { %v1960_v30 = vpack.c.b16 %v1952_v22, %v1948_v48  ;;  %2014 = vmatpush.bf16.msrb.mxu0 %v3677_v39  ;;  %2033 = vmatpush.bf16.msrb.mxu1 %v3679_v1  ;;  %v1832_v26 = vunpack.c.h.b16 %v3927_v53  ;;  %v1247_v4 = vmul.f32 %v3926_v20, %v3930_v28  ;;  %v1248_v62 = vmul.f32 %v3929_v33, %v3931_v3 }
 0x33f   :  { %2047 = vmatpush.bf16.msrb.mxu2 %v1959_v58  ;;  %v1827_v29 = vunpack.c.l.b16 %v1266_v57  ;;  %v1828_v13 = vunpack.c.h.b16 %v1266_v57  ;;  %v1251_v54 = vmul.f32 %v3926_v20, %v3932_v59  ;;  %v1955_v45 = vpack.c.b16 %v1943_v10, %v1939_v18  ;;  %v2442_v20 = vld [vmem:[%s3816_s10] sm:$0xff] }
 0x340   :  { %2066 = vmatpush.bf16.msrb.mxu3 %v1960_v30  ;;  %v1252_v39 = vmul.f32 %v3929_v33, %v3933_v41  ;;  %v1956_v1 = vpack.c.b16 %v1944_v43, %v1940_v37  ;;  %v1262_v34 = vpack.c.bf16 %v1248_v62, %v1247_v4 }
 0x341   :  { %v1839_v49 = vpack.c.b16 %v1831_v42, %v1827_v29  ;;  %v1840_v8 = vpack.c.b16 %v1832_v26, %v1828_v13 }
 0x342   :  { %2015 = vmatpush.bf16.msrb.mxu0 %v3697_v55  ;;  %2034 = vmatpush.bf16.msrb.mxu1 %v3699_v31  ;;  %v1264_v38 = vpack.c.bf16 %v1252_v39, %v1251_v54  ;;  %v1819_v9 = vunpack.c.l.b16 %v1262_v34  ;;  %v1820_v0 = vunpack.c.h.b16 %v1262_v34  ;;  %v2443_v55 = vld [vmem:[%s3816_s10 + $0x8] sm:$0xff]  ;;  %v1973_v31 = vld [vmem:[%s3817_s11] sm:$0xff]  ;;  %s2546_s10 = smov [#allocation5]  }
 0x343   :  { %2048 = vmatpush.bf16.msrb.mxu2 %v1955_v45  ;;  %1979 = vperm.xlu2 %2454, %v1973_v31  }
 0x344   :  { %2067 = vmatpush.bf16.msrb.mxu3 %v1956_v1  ;;  %v1823_v5 = vunpack.c.l.b16 %v1264_v38  ;;  %v1824_v46 = vunpack.c.h.b16 %v1264_v38 }
 0x346   :  { %2016 = vmatpush.bf16.msrb.mxu0 %v3732_v14  ;;  %2035 = vmatpush.bf16.msrb.mxu1 %v3734_v25  ;;  %v1835_v24 = vpack.c.b16 %v1823_v5, %v1819_v9  ;;  %v1836_v6 = vpack.c.b16 %v1824_v46, %v1820_v0 }
 0x347   :  { %2049 = vmatpush.bf16.msrb.mxu2 %v3726_v12  ;;  %v1974_v12 = vld [vmem:[%s3817_s11 + $0x8] sm:$0xff]  ;;  %s2105_s11 = sshll.u32 %s2546_s10, 4  ;;  %s2106_s11 = int_to_ptr.vmem [resolvable:$true] %s2105_s11 }
 0x348   :  { %2068 = vmatpush.bf16.msrb.mxu3 %v3728_v60 }
 0x349   :  { %2017 = vmatmul.bf16.vlgmr.msrb.gmra.mxu0 %v2442_v20  ;;  %2036 = vmatmul.bf16.vlgmr.msrb.gmra.mxu1 %v2442_v20 }
 0x34b   :  { %2050 = vmatpush.bf16.msrb.mxu2 %v3757_v19  ;;  %1984 = vperm.xlu2 %2454, %v1974_v12  }
 0x34c   :  { %2069 = vmatpush.bf16.msrb.mxu3 %v3759_v32  ;;  %v1990_v32 = vpop.permute.xlu0 %1989 }
 0x34f   :  { %2051 = vmatpush.bf16.msrb.mxu2 %v1879_v21 }
 0x350   :  { %2070 = vmatpush.bf16.msrb.mxu3 %v1880_v36 }
 0x353   :  { %2052 = vmatpush.bf16.msrb.mxu2 %v1875_v50 }
 0x354   :  { %2071 = vmatpush.bf16.msrb.mxu3 %v1876_v27 }
 0x357   :  { %2053 = vmatpush.bf16.msrb.mxu2 %v1839_v49 }
 0x358   :  { %2072 = vmatpush.bf16.msrb.mxu3 %v1840_v8 }
 0x359   :  { %2022 = vmatmul.bf16.gmra.mxu0 %v2443_v55  ;;  %2041 = vmatmul.bf16.gmra.mxu1 %v2443_v55 }
 0x35b   :  { %2054 = vmatpush.bf16.msrb.mxu2 %v1835_v24 }
 0x35c   :  { %2073 = vmatpush.bf16.msrb.mxu3 %v1836_v6 }
 0x35e   :  { %2055 = vmatmul.bf16.vlgmr.msrb.gmra.mxu2 %v2442_v20 }
 0x35f   :  { %2074 = vmatmul.bf16.vlgmr.msrb.gmra.mxu3 %v2442_v20 }
 0x36e   :  { %2060 = vmatmul.bf16.gmra.mxu2 %v2443_v55 }
 0x36f   :  { %2079 = vmatmul.bf16.gmra.mxu3 %v2443_v55 }
 0x39d   :  { %v1980_v22 = vpop.permute.xlu2 %1979 }
 0x3a5   :  { %v1985_v37 = vpop.permute.xlu2 %1984 }
 0x3c6   :  { %v2018_v60 = vpop.f32.mrf.mxu0  ;;  %v2037_v14 = vpop.f32.mrf.mxu1 }
 0x3c7   :  { %v2019_v23 = vadd.f32 %v2018_v60, %v1980_v22  ;;  %v2038_v48 = vadd.f32 %v2037_v14, %v1980_v22 }
 0x3c9   :  { %2085 = vst [vmem:[#allocation5] sm:$0xff] %v2019_v23 }
 0x3ca   :  { %2086 = vst [vmem:[#allocation5 + $0x8] sm:$0xff] %v2038_v48 }
 0x3ce   :  { %v2020_v25 = vpop.f32.mrf.mxu0  ;;  %v2039_v19 = vpop.f32.mrf.mxu1 }
 0x3cf   :  { %v2021_v43 = vadd.f32 %v2020_v25, %v1985_v37  ;;  %v2040_v58 = vadd.f32 %v2039_v19, %v1985_v37 }
 0x3d1   :  { %2089 = vst [vmem:[#allocation5 + $0x20] sm:$0xff] %v2021_v43 }
 0x3d2   :  { %2090 = vst [vmem:[#allocation5 + $0x28] sm:$0xff] %v2040_v58 }
 0x3d6   :  { %v2023_v53 = vpop.f32.mrf.mxu0  ;;  %v2042_v42 = vpop.f32.mrf.mxu1 }
 0x3d7   :  { %v2024_v7 = vadd.f32 %v2023_v53, %v1990_v32  ;;  %v2043_v51 = vadd.f32 %v2042_v42, %v1990_v32 }
 0x3d9   :  { %2093 = vst [vmem:[#allocation5 + $0x40] sm:$0xff] %v2024_v7 }
 0x3da   :  { %2094 = vst [vmem:[#allocation5 + $0x48] sm:$0xff] %v2043_v51 }
 0x3de   :  { %v2025_v15 = vpop.f32.mrf.mxu0  ;;  %v2044_v21 = vpop.f32.mrf.mxu1 }
 0x3df   :  { %v2026_v36 = vadd.f32 %v2025_v15, %v1995_v40  ;;  %v2045_v35 = vadd.f32 %v2044_v21, %v1995_v40 }
 0x3e1   :  { %2097 = vst [vmem:[#allocation5 + $0x60] sm:$0xff] %v2026_v36  ;;  %v2056_v16 = vpop.f32.mrf.mxu2 }
 0x3e2   :  { %v2075_v44 = vpop.f32.mrf.mxu3  ;;  %2098 = vst [vmem:[#allocation5 + $0x68] sm:$0xff] %v2045_v35  ;;  %v2057_v18 = vadd.f32 %v2056_v16, %v1980_v22 }
 0x3e3   :  { %v2076_v10 = vadd.f32 %v2075_v44, %v1980_v22 }
 0x3e4   :  { %2087 = vst [vmem:[#allocation5 + $0x10] sm:$0xff] %v2057_v18 }
 0x3e5   :  { %2088 = vst [vmem:[#allocation5 + $0x18] sm:$0xff] %v2076_v10 }
 0x3e9   :  { %v2058_v47 = vpop.f32.mrf.mxu2 }
 0x3ea   :  { %v2077_v2 = vpop.f32.mrf.mxu3  ;;  %v2059_v30 = vadd.f32 %v2058_v47, %v1985_v37 }
 0x3eb   :  { %v2078_v27 = vadd.f32 %v2077_v2, %v1985_v37 }
 0x3ec   :  { %2091 = vst [vmem:[#allocation5 + $0x30] sm:$0xff] %v2059_v30 }
 0x3ed   :  { %2092 = vst [vmem:[#allocation5 + $0x38] sm:$0xff] %v2078_v27 }
 0x3f1   :  { %v2061_v52 = vpop.f32.mrf.mxu2 }
 0x3f2   :  { %v2080_v50 = vpop.f32.mrf.mxu3  ;;  %v2062_v61 = vadd.f32 %v2061_v52, %v1990_v32 }
 0x3f3   :  { %v2081_v63 = vadd.f32 %v2080_v50, %v1990_v32 }
 0x3f4   :  { %2095 = vst [vmem:[#allocation5 + $0x50] sm:$0xff] %v2062_v61 }
 0x3f5   :  { %2096 = vst [vmem:[#allocation5 + $0x58] sm:$0xff] %v2081_v63 }
 0x3f9   :  { %v2063_v17 = vpop.f32.mrf.mxu2 }
 0x3fa   :  { %v2082_v33 = vpop.f32.mrf.mxu3  ;;  %v2064_v56 = vadd.f32 %v2063_v17, %v1995_v40 }
 0x3fb   :  { %v2083_v11 = vadd.f32 %v2082_v33, %v1995_v40 }
 0x3fc   :  { %2099 = vst [vmem:[#allocation5 + $0x70] sm:$0xff] %v2064_v56 }
 0x3fd   :  { %2100 = vst [vmem:[#allocation5 + $0x78] sm:$0xff] %v2083_v11 }
 0x3fe   :  { %2113 = dma.vmem_to_hbm [thread:$0]  %s2106_s11, 2048, %s2108_s25, [#allocation4], %s2547_s26, %s2547_s26, %s2548_s7  }
 0x3ff   :  { %2539 = dma.done.wait [#allocation4], 2048  }
 0x400   :  { %2540 = vsyncadd [#allocation4], 4294965248 }
 0x401   :  { %2118 = vsyncpa [#allocation3], 1 }
 0x402   :  { %2119 = vsyncpa [#allocation4], 1 }

</bundles_post_ra>
